<compile_context>
chip_gen: v6e
topology: v6e:2x2x1
jax: 0.10.0
libtpu: 0.0.40
codegen_flags: <defaults>
</compile_context>

<pallas_src>
import math

import jax
import jax.numpy as jnp
from jax.experimental import pallas as pl
from jax.experimental.pallas import tpu as pltpu

# ---- problem sizes (small, but feature dims fixed by the module) ----
B = 2
H = W = 16
C_IN = 3
HW = H * W
IMG_FEAT = 2048      # EfficientNet-b5: self.base._fc.in_features
TXT_FEAT = 768       # DistilBERT hidden size
HEAD_DIM = 64
SEQ = 8
VOCAB = 128
NUM_CLASSES = 16
CLS_PAD = 128        # classifier output padded to one full lane tile


# ---------------------------------------------------------------------------
# Single fused kernel: image pool -> folded classifier, embedding gather as a
# one-hot matmul against the folded QKV table, masked CLS attention, folded
# text classifier, final add.
# ---------------------------------------------------------------------------
def _fused_kernel(img_ref, ids_ref, w_pool_cls_ref, w_tok_qkv_ref,
                  w_ctx_cls_ref, b_cls_ref, o_ref):
    # ---------------- image branch ----------------
    # mean(proj(x)) @ W_cls == mean(x) @ (W_img @ W_cls_img)  (exact, linear).
    # Pool over the 256-wide lane axis, then hit the tiny folded (3, 128)
    # weight with VPU broadcast-FMAs (M=2, K=3 would waste an MXU push).
    pooled = jnp.mean(img_ref[...], axis=-1)                     # (B, C_IN) f32
    w_pc = w_pool_cls_ref[...]                                   # (C_IN, CLS_PAD)
    img_logits = (pooled[:, 0:1] * w_pc[0:1, :]
                  + pooled[:, 1:2] * w_pc[1:2, :]
                  + pooled[:, 2:3] * w_pc[2:3, :])               # (B, CLS_PAD)

    # ---------------- text branch -----------------
    ids_col = ids_ref[...]                                       # (B*SEQ, 1) int32
    # Embedding gather as a one-hot matmul (stays on the MXU).  emb @ Wqkv is
    # folded at init, so this single matmul produces QKV directly.
    iota = jax.lax.broadcasted_iota(jnp.int32, (B * SEQ, VOCAB), 1)
    onehot = (ids_col == iota).astype(jnp.bfloat16)              # (B*SEQ, VOCAB)
    qkv = jnp.dot(onehot, w_tok_qkv_ref[...],
                  preferred_element_type=jnp.float32)            # (B*SEQ, 3*HEAD) f32

    ctx_rows = []
    for b in range(B):                                           # B=2, unrolled
        qkv_b = qkv[b * SEQ:(b + 1) * SEQ, :]                    # (SEQ, 3*HEAD)
        q = qkv_b[0:1, 0:HEAD_DIM]               # CLS query (1/sqrt(d) folded in)
        k = qkv_b[:, HEAD_DIM:2 * HEAD_DIM]                      # (SEQ, HEAD)
        v = qkv_b[:, 2 * HEAD_DIM:3 * HEAD_DIM]                  # (SEQ, HEAD)

        s = jnp.sum(k * q, axis=-1, keepdims=True)               # (SEQ, 1) scores
        valid = ids_col[b * SEQ:(b + 1) * SEQ, :] != 0           # attention mask
        s = jnp.where(valid, s, -1e30)                           # fp32-safe mask
        s = s - jnp.max(s, axis=0, keepdims=True)
        e = jnp.exp(s)
        p = e / jnp.sum(e, axis=0, keepdims=True)                # exact softmax
        ctx_rows.append(jnp.sum(p * v, axis=0, keepdims=True))   # (1, HEAD)

    ctx = jnp.concatenate(ctx_rows, axis=0)                      # (B, HEAD) f32
    # Wo @ W_cls_txt folded at init -> (HEAD, CLS_PAD) bf16.
    txt_logits = jnp.dot(ctx.astype(jnp.bfloat16), w_ctx_cls_ref[...],
                         preferred_element_type=jnp.float32)     # (B, CLS_PAD)

    # Classifier bias already includes the folded image-branch bias.
    o_ref[...] = img_logits + txt_logits + b_cls_ref[...]        # (B, CLS_PAD)


# ---------------------------------------------------------------------------
# Full model forward — single grid-less pallas_call; wrapper is layout only.
# ---------------------------------------------------------------------------
def model_forward(images, input_ids, params):
    Bc = images.shape[0]
    # Lane-dense image layout: (B, C_IN, H*W) so the spatial mean reduces lanes.
    img = images.transpose(0, 3, 1, 2).reshape(Bc, C_IN, HW)
    # Token ids as a sublane column vector (drives both the gather and the mask).
    ids_col = input_ids.reshape(Bc * SEQ, 1).astype(jnp.int32)

    vmem = pl.BlockSpec(memory_space=pltpu.MemorySpace.VMEM)
    logits_pad = pl.pallas_call(
        _fused_kernel,
        out_shape=jax.ShapeDtypeStruct((Bc, CLS_PAD), jnp.float32),
        in_specs=[vmem] * 6,
        out_specs=vmem,
    )(img, ids_col, params["w_pool_cls"], params["w_tok_qkv"],
      params["w_ctx_cls"], params["b_cls"])
    return logits_pad[:, :NUM_CLASSES]


def init_params(key):
    ks = jax.random.split(key, 8)

    # --- reference (unfolded) weights, matching the original module shapes ---
    w_img = 0.02 * jax.random.normal(ks[0], (C_IN, IMG_FEAT), jnp.float32)
    b_img = jnp.zeros((1, IMG_FEAT), jnp.float32)
    emb = 0.02 * jax.random.normal(ks[1], (VOCAB, TXT_FEAT), jnp.float32)
    wq = 0.02 * jax.random.normal(ks[2], (TXT_FEAT, HEAD_DIM), jnp.float32)
    wk = 0.02 * jax.random.normal(ks[3], (TXT_FEAT, HEAD_DIM), jnp.float32)
    wv = 0.02 * jax.random.normal(ks[4], (TXT_FEAT, HEAD_DIM), jnp.float32)
    wo = 0.02 * jax.random.normal(ks[5], (HEAD_DIM, TXT_FEAT), jnp.float32)
    w_cls = 0.02 * jax.random.normal(
        ks[6], (IMG_FEAT + TXT_FEAT, NUM_CLASSES), jnp.float32)
    b_cls = jnp.zeros((NUM_CLASSES,), jnp.float32)

    pad = CLS_PAD - NUM_CLASSES
    # Split the classifier weight (avoids the concat) and zero-pad the output
    # dimension to a full 128-lane tile (unmasked stores); wrapper slices back.
    w_cls_img = jnp.pad(w_cls[:IMG_FEAT], ((0, 0), (0, pad)))    # (IMG_FEAT, CLS_PAD)
    w_cls_txt = jnp.pad(w_cls[IMG_FEAT:], ((0, 0), (0, pad)))    # (TXT_FEAT, CLS_PAD)
    b_cls_pad = jnp.pad(b_cls, (0, pad)).reshape(1, CLS_PAD)

    # Fold #1: image projection folded into the classifier; bias merged too.
    w_pool_cls = w_img @ w_cls_img                               # (C_IN, CLS_PAD) f32
    b_total = b_cls_pad + b_img @ w_cls_img                      # (1, CLS_PAD)  f32

    # Fold #2: embedding table folded into the fused QKV projection
    # (1/sqrt(d) attention scale folded into the Q columns).  Stored bf16.
    wqkv = jnp.concatenate([wq / math.sqrt(HEAD_DIM), wk, wv], axis=1)
    w_tok_qkv = (emb @ wqkv).astype(jnp.bfloat16)                # (VOCAB, 3*HEAD)

    # Fold #3: attention output projection folded into the classifier text half.
    w_ctx_cls = (wo @ w_cls_txt).astype(jnp.bfloat16)            # (HEAD, CLS_PAD)

    return {
        "w_pool_cls": w_pool_cls,
        "w_tok_qkv": w_tok_qkv,
        "w_ctx_cls": w_ctx_cls,
        "b_cls": b_total,
    }


if __name__ == "__main__":
    key = jax.random.PRNGKey(0)
    k_img, k_tok, k_par = jax.random.split(key, 3)

    images = jax.random.normal(k_img, (B, H, W, C_IN), jnp.float32)   # NHWC
    input_ids = jax.random.randint(k_tok, (B, SEQ), 1, VOCAB, dtype=jnp.int32)
    input_ids = input_ids.at[1, -2:].set(0)  # padding tokens -> exercises attention_mask

    params = init_params(k_par)

    logits = jax.jit(model_forward)(images, input_ids, params)
    jax.block_until_ready(logits)

    assert logits.shape == (B, NUM_CLASSES)
    assert logits.dtype == jnp.float32
    print("KERNEL_OK")
</pallas_src>

<mosaic_0001>
module attributes {stable_mosaic.version = 11 : i64} {
  func.func @_fused_kernel(%arg0: memref<2x3x256xf32, #tpu.memory_space<vmem>>, %arg1: memref<16x1xi32, #tpu.memory_space<vmem>>, %arg2: memref<3x128xf32, #tpu.memory_space<vmem>>, %arg3: memref<128x192xbf16, #tpu.memory_space<vmem>>, %arg4: memref<64x128xbf16, #tpu.memory_space<vmem>>, %arg5: memref<1x128xf32, #tpu.memory_space<vmem>>, %arg6: memref<2x128xf32, #tpu.memory_space<vmem>>) attributes {dimension_semantics = [], scalar_prefetch = 0 : i64, scratch_operands = 0 : i64, tpu.core_type = #tpu.core_type<tc>} {
    %c0 = arith.constant 0 : index
    %c0_0 = arith.constant 0 : index
    %c0_1 = arith.constant 0 : index
    %0 = vector.load %arg0[%c0, %c0_0, %c0_1] : memref<2x3x256xf32, #tpu.memory_space<vmem>>, vector<2x3x256xf32>
    %cst = arith.constant dense<0.000000e+00> : vector<2x3xf32>
    %1 = vector.multi_reduction <add>, %0, %cst [2] : vector<2x3x256xf32> to vector<2x3xf32>
    %cst_2 = arith.constant 2.560000e+02 : f32
    %2 = vector.broadcast %cst_2 : f32 to vector<2x3xf32>
    %3 = arith.divf %1, %2 : vector<2x3xf32>
    %c0_3 = arith.constant 0 : index
    %c0_4 = arith.constant 0 : index
    %4 = vector.load %arg2[%c0_3, %c0_4] : memref<3x128xf32, #tpu.memory_space<vmem>>, vector<3x128xf32>
    %5 = vector.extract_strided_slice %3 {offsets = [0, 0], sizes = [2, 1], strides = [1, 1]} : vector<2x3xf32> to vector<2x1xf32>
    %6 = vector.extract_strided_slice %4 {offsets = [0, 0], sizes = [1, 128], strides = [1, 1]} : vector<3x128xf32> to vector<1x128xf32>
    %7 = vector.broadcast %5 : vector<2x1xf32> to vector<2x128xf32>
    %8 = vector.broadcast %6 : vector<1x128xf32> to vector<2x128xf32>
    %9 = arith.mulf %7, %8 : vector<2x128xf32>
    %10 = vector.extract_strided_slice %3 {offsets = [0, 1], sizes = [2, 1], strides = [1, 1]} : vector<2x3xf32> to vector<2x1xf32>
    %11 = vector.extract_strided_slice %4 {offsets = [1, 0], sizes = [1, 128], strides = [1, 1]} : vector<3x128xf32> to vector<1x128xf32>
    %12 = vector.broadcast %10 : vector<2x1xf32> to vector<2x128xf32>
    %13 = vector.broadcast %11 : vector<1x128xf32> to vector<2x128xf32>
    %14 = arith.mulf %12, %13 : vector<2x128xf32>
    %15 = arith.addf %9, %14 : vector<2x128xf32>
    %16 = vector.extract_strided_slice %3 {offsets = [0, 2], sizes = [2, 1], strides = [1, 1]} : vector<2x3xf32> to vector<2x1xf32>
    %17 = vector.extract_strided_slice %4 {offsets = [2, 0], sizes = [1, 128], strides = [1, 1]} : vector<3x128xf32> to vector<1x128xf32>
    %18 = vector.broadcast %16 : vector<2x1xf32> to vector<2x128xf32>
    %19 = vector.broadcast %17 : vector<1x128xf32> to vector<2x128xf32>
    %20 = arith.mulf %18, %19 : vector<2x128xf32>
    %21 = arith.addf %15, %20 : vector<2x128xf32>
    %c0_5 = arith.constant 0 : index
    %c0_6 = arith.constant 0 : index
    %22 = vector.load %arg1[%c0_5, %c0_6] : memref<16x1xi32, #tpu.memory_space<vmem>>, vector<16x1xi32>
    %23 = tpu.iota {dimensions = array<i32: 1>} : vector<16x128xi32>
    %24 = vector.broadcast %22 : vector<16x1xi32> to vector<16x128xi32>
    %25 = arith.cmpi eq, %24, %23 : vector<16x128xi32>
    %26 = arith.extui %25 : vector<16x128xi1> to vector<16x128xi32>
    %27 = arith.sitofp %26 : vector<16x128xi32> to vector<16x128xf32>
    %28 = arith.truncf %27 : vector<16x128xf32> to vector<16x128xbf16>
    %c0_7 = arith.constant 0 : index
    %c0_8 = arith.constant 0 : index
    %29 = vector.load %arg3[%c0_7, %c0_8] : memref<128x192xbf16, #tpu.memory_space<vmem>>, vector<128x192xbf16>
    %cst_9 = arith.constant dense<0.000000e+00> : vector<16x192xf32>
    %30 = tpu.matmul %28, %29, %cst_9 {dimension_numbers = #tpu.dot_dimension_numbers<[1], [0], [0], [1], [0, 0, 1, 1], [], []>} : vector<16x128xbf16>, vector<128x192xbf16>, vector<16x192xf32> -> vector<16x192xf32>
    %31 = vector.extract_strided_slice %30 {offsets = [0, 0], sizes = [8, 192], strides = [1, 1]} : vector<16x192xf32> to vector<8x192xf32>
    %32 = vector.extract_strided_slice %31 {offsets = [0, 0], sizes = [1, 64], strides = [1, 1]} : vector<8x192xf32> to vector<1x64xf32>
    %33 = vector.extract_strided_slice %31 {offsets = [0, 64], sizes = [8, 64], strides = [1, 1]} : vector<8x192xf32> to vector<8x64xf32>
    %34 = vector.extract_strided_slice %31 {offsets = [0, 128], sizes = [8, 64], strides = [1, 1]} : vector<8x192xf32> to vector<8x64xf32>
    %35 = vector.broadcast %32 : vector<1x64xf32> to vector<8x64xf32>
    %36 = arith.mulf %33, %35 : vector<8x64xf32>
    %cst_10 = arith.constant dense<0.000000e+00> : vector<8xf32>
    %37 = vector.multi_reduction <add>, %36, %cst_10 [1] : vector<8x64xf32> to vector<8xf32>
    %38 = vector.shape_cast %37 : vector<8xf32> to vector<8x1xf32>
    %39 = vector.extract_strided_slice %22 {offsets = [0, 0], sizes = [8, 1], strides = [1, 1]} : vector<16x1xi32> to vector<8x1xi32>
    %c0_i32 = arith.constant 0 : i32
    %40 = vector.broadcast %c0_i32 : i32 to vector<8x1xi32>
    %41 = arith.cmpi ne, %39, %40 : vector<8x1xi32>
    %cst_11 = arith.constant -1.000000e+30 : f32
    %42 = vector.broadcast %cst_11 : f32 to vector<8x1xf32>
    %43 = arith.select %41, %38, %42 : vector<8x1xi1>, vector<8x1xf32>
    %cst_12 = arith.constant dense<0xFF800000> : vector<1xf32>
    %44 = vector.multi_reduction <maximumf>, %43, %cst_12 [0] : vector<8x1xf32> to vector<1xf32>
    %45 = vector.shape_cast %44 : vector<1xf32> to vector<1x1xf32>
    %46 = vector.broadcast %45 : vector<1x1xf32> to vector<8x1xf32>
    %47 = arith.subf %43, %46 : vector<8x1xf32>
    %48 = math.exp %47 : vector<8x1xf32>
    %cst_13 = arith.constant dense<0.000000e+00> : vector<1xf32>
    %49 = vector.multi_reduction <add>, %48, %cst_13 [0] : vector<8x1xf32> to vector<1xf32>
    %50 = vector.shape_cast %49 : vector<1xf32> to vector<1x1xf32>
    %51 = vector.broadcast %50 : vector<1x1xf32> to vector<8x1xf32>
    %52 = arith.divf %48, %51 : vector<8x1xf32>
    %53 = vector.broadcast %52 : vector<8x1xf32> to vector<8x64xf32>
    %54 = arith.mulf %53, %34 : vector<8x64xf32>
    %cst_14 = arith.constant dense<0.000000e+00> : vector<64xf32>
    %55 = vector.multi_reduction <add>, %54, %cst_14 [0] : vector<8x64xf32> to vector<64xf32>
    %56 = vector.shape_cast %55 : vector<64xf32> to vector<1x64xf32>
    %57 = vector.extract_strided_slice %30 {offsets = [8, 0], sizes = [8, 192], strides = [1, 1]} : vector<16x192xf32> to vector<8x192xf32>
    %58 = vector.extract_strided_slice %57 {offsets = [0, 0], sizes = [1, 64], strides = [1, 1]} : vector<8x192xf32> to vector<1x64xf32>
    %59 = vector.extract_strided_slice %57 {offsets = [0, 64], sizes = [8, 64], strides = [1, 1]} : vector<8x192xf32> to vector<8x64xf32>
    %60 = vector.extract_strided_slice %57 {offsets = [0, 128], sizes = [8, 64], strides = [1, 1]} : vector<8x192xf32> to vector<8x64xf32>
    %61 = vector.broadcast %58 : vector<1x64xf32> to vector<8x64xf32>
    %62 = arith.mulf %59, %61 : vector<8x64xf32>
    %cst_15 = arith.constant dense<0.000000e+00> : vector<8xf32>
    %63 = vector.multi_reduction <add>, %62, %cst_15 [1] : vector<8x64xf32> to vector<8xf32>
    %64 = vector.shape_cast %63 : vector<8xf32> to vector<8x1xf32>
    %65 = vector.extract_strided_slice %22 {offsets = [8, 0], sizes = [8, 1], strides = [1, 1]} : vector<16x1xi32> to vector<8x1xi32>
    %c0_i32_16 = arith.constant 0 : i32
    %66 = vector.broadcast %c0_i32_16 : i32 to vector<8x1xi32>
    %67 = arith.cmpi ne, %65, %66 : vector<8x1xi32>
    %cst_17 = arith.constant -1.000000e+30 : f32
    %68 = vector.broadcast %cst_17 : f32 to vector<8x1xf32>
    %69 = arith.select %67, %64, %68 : vector<8x1xi1>, vector<8x1xf32>
    %cst_18 = arith.constant dense<0xFF800000> : vector<1xf32>
    %70 = vector.multi_reduction <maximumf>, %69, %cst_18 [0] : vector<8x1xf32> to vector<1xf32>
    %71 = vector.shape_cast %70 : vector<1xf32> to vector<1x1xf32>
    %72 = vector.broadcast %71 : vector<1x1xf32> to vector<8x1xf32>
    %73 = arith.subf %69, %72 : vector<8x1xf32>
    %74 = math.exp %73 : vector<8x1xf32>
    %cst_19 = arith.constant dense<0.000000e+00> : vector<1xf32>
    %75 = vector.multi_reduction <add>, %74, %cst_19 [0] : vector<8x1xf32> to vector<1xf32>
    %76 = vector.shape_cast %75 : vector<1xf32> to vector<1x1xf32>
    %77 = vector.broadcast %76 : vector<1x1xf32> to vector<8x1xf32>
    %78 = arith.divf %74, %77 : vector<8x1xf32>
    %79 = vector.broadcast %78 : vector<8x1xf32> to vector<8x64xf32>
    %80 = arith.mulf %79, %60 : vector<8x64xf32>
    %cst_20 = arith.constant dense<0.000000e+00> : vector<64xf32>
    %81 = vector.multi_reduction <add>, %80, %cst_20 [0] : vector<8x64xf32> to vector<64xf32>
    %82 = vector.shape_cast %81 : vector<64xf32> to vector<1x64xf32>
    %83 = tpu.concatenate %56, %82 in 0 : vector<1x64xf32>, vector<1x64xf32> -> vector<2x64xf32>
    %84 = arith.truncf %83 : vector<2x64xf32> to vector<2x64xbf16>
    %c0_21 = arith.constant 0 : index
    %c0_22 = arith.constant 0 : index
    %85 = vector.load %arg4[%c0_21, %c0_22] : memref<64x128xbf16, #tpu.memory_space<vmem>>, vector<64x128xbf16>
    %cst_23 = arith.constant dense<0.000000e+00> : vector<2x128xf32>
    %86 = tpu.matmul %84, %85, %cst_23 {dimension_numbers = #tpu.dot_dimension_numbers<[1], [0], [0], [1], [0, 0, 1, 1], [], []>} : vector<2x64xbf16>, vector<64x128xbf16>, vector<2x128xf32> -> vector<2x128xf32>
    %87 = arith.addf %21, %86 : vector<2x128xf32>
    %c0_24 = arith.constant 0 : index
    %c0_25 = arith.constant 0 : index
    %88 = vector.load %arg5[%c0_24, %c0_25] : memref<1x128xf32, #tpu.memory_space<vmem>>, vector<1x128xf32>
    %89 = vector.broadcast %88 : vector<1x128xf32> to vector<2x128xf32>
    %90 = arith.addf %87, %89 : vector<2x128xf32>
    %c0_26 = arith.constant 0 : index
    %c0_27 = arith.constant 0 : index
    %91 = vector.load %arg6[%c0_26, %c0_27] : memref<2x128xf32, #tpu.memory_space<vmem>>, vector<2x128xf32>
    tpu.vector_store %arg6[%c0_26, %c0_27], %90 {strides = array<i32>} : memref<2x128xf32, #tpu.memory_space<vmem>>, vector<2x128xf32>,
    return
  }
}

</mosaic_0001>

<bundles_post_ra>
// kernel: model_forward.1
= control target key start
LH: loop header
LB: loop body
LE: loop exit
PB: predicated region body
PF: predicated region fallthrough
CT: control target
= control target key end

     0   :  { %v1581_v1 = vmov 0   ;;  %s2217_s0 = inlined_call_operand.vmem [shape: f32[2,3,256], index: 0, kind: input, shape index: {}]   ;;  %s2218_s1 = inlined_call_operand.vmem [shape: s32[16,1], index: 1, kind: input, shape index: {}]   ;;  %s2219_s2 = inlined_call_operand.vmem [shape: f32[3,128], index: 2, kind: input, shape index: {}]   ;;  %s2220_s3 = inlined_call_operand.vmem [shape: bf16[128,192], index: 3, kind: input, shape index: {}]   ;;  %s2221_s4 = inlined_call_operand.vmem [shape: bf16[64,128], index: 4, kind: input, shape index: {}]   ;;  %s2222_s5 = inlined_call_operand.vmem [shape: f32[1,128], index: 5, kind: input, shape index: {}]   ;;  %s2223_s6 = inlined_call_operand.hbm [shape: f32[2,128], index: 6, kind: output, shape index: {}]  }
   0x1   :  { %v1625_v0 = vld [vmem:[%s2218_s1] sm:$0xff]  ;;  %1519 = vset.pattern.permute.xlu0 %v1581_v1  ;;  %v1521_v2 = vld [vmem:[%s2220_s3 + $0x74] ss:$8 sps:$4 sm:$0xff]   ;;  %v1523_v3 = vld [vmem:[%s2220_s3 + $0x70] ss:$8 sps:$4 sm:$0xff]   ;;  %629 = vmatprep.mubr.bf16.mxu0 %v1581_v1 }
   0x2   :  { %489 = vperm.xlu0 %1519, %v1625_v0   ;;  %v1524_v4 = vld [vmem:[%s2220_s3 + $0x64] ss:$8 sps:$4 sm:$0xff]   ;;  %1520 = vset.pattern.permute.xlu1 %v1581_v1  ;;  %v1526_v6 = vld [vmem:[%s2220_s3 + $0x60] ss:$8 sps:$4 sm:$0xff]   ;;  %v1527_v7 = vld [vmem:[%s2220_s3 + $0x54] ss:$8 sps:$4 sm:$0xff]  }
   0x3   :  { %v1640_v5 = vld [vmem:[%s2218_s1 + $0x8] sm:$0xff]  ;;  %597 = vmatprep.subr.bf16.mxu0 %v1521_v2  ;;  %v1529_v8 = vld [vmem:[%s2220_s3 + $0x50] ss:$8 sps:$4 sm:$0xff]   ;;  %v1533_v11 = vld [vmem:[%s2220_s3 + $0x34] ss:$8 sps:$4 sm:$0xff]  }
   0x4   :  { %598 = vmatpush1.bf16.msra.mxu0 %v1523_v3  ;;  %v1530_v9 = vld [vmem:[%s2220_s3 + $0x44] ss:$8 sps:$4 sm:$0xff]   ;;  %v1532_v10 = vld [vmem:[%s2220_s3 + $0x40] ss:$8 sps:$4 sm:$0xff]  }
   0x5   :  { %599 = vmatprep.subr.bf16.mxu0 %v1524_v4 }
   0x6   :  { %492 = vperm.xlu0 %1519, %v1640_v5  }
   0x8   :  { %600 = vmatpush1.bf16.msra.mxu0 %v1526_v6 }
   0x9   :  { %601 = vmatprep.subr.bf16.mxu0 %v1527_v7 }
   0xc   :  { %602 = vmatpush1.bf16.msra.mxu0 %v1529_v8 }
   0xd   :  { %603 = vmatprep.subr.bf16.mxu0 %v1530_v9 }
   0xe   :  { %11 = vsyncpa [#allocation3], 0  ;;  %v1535_v12 = vld [vmem:[%s2220_s3 + $0x30] ss:$8 sps:$4 sm:$0xff]   ;;  %v1536_v13 = vld [vmem:[%s2220_s3 + $0x24] ss:$8 sps:$4 sm:$0xff]   ;;  %v48_v19 = vlaneseq }
   0xf   :  { %v1538_v14 = vld [vmem:[%s2220_s3 + $0x20] ss:$8 sps:$4 sm:$0xff]   ;;  %v1539_v15 = vld [vmem:[%s2220_s3 + $0x14] ss:$8 sps:$4 sm:$0xff]   ;;  %v1541_v16 = vld [vmem:[%s2220_s3 + $0x10] ss:$8 sps:$4 sm:$0xff]  }
  0x10   :  { %604 = vmatpush1.bf16.msra.mxu0 %v1532_v10  ;;  %v1542_v17 = vld [vmem:[%s2220_s3 + $0x4] ss:$8 sps:$4 sm:$0xff]   ;;  %v1544_v18 = vld [vmem:[%s2220_s3] ss:$8 sps:$4 sm:$0xff]   ;;  %v1682_v21 = vand.u32 127, %v48_v19  ;;  %v1686_v24 = vshrl.u32 %v48_v19, 7 }
  0x11   :  { %605 = vmatprep.subr.bf16.mxu0 %v1533_v11  ;;  %v1582_v23 = vmov 1.0|1.0   ;;  %s1583_s3 = smov 64   ;;  %vm653_vm3 = vcmask 523264   ;;  %vm657_vm4 = vcmp.ne.s32.totalorder %v1625_v0, 0  ;;  %vm659_vm5 = vcmask 7168  }
  0x12   :  { %2267 = vst [vmem:[#allocation5_spill] sm:$0xff] %v1682_v21  ;;  %2268 = vst [vmem:[#allocation6_spill] sm:$0xff] %v1686_v24  ;;  %v1689_v25 = vsub.s32 0, %v1686_v24  ;;  %vm708_vm6 = vcmp.ne.s32.totalorder %v1640_v5, 0  ;;  %v1548_v19 = vld [vmem:[%s2221_s4 + $0x10] sm:$0xff]   ;;  %vm1585_vm7 = vmmov 0  }
  0x13   :  { %vm33_vm8 = vcmask 1042432   ;;  %vm742_vm9 = vcmask 1040384   ;;  %vm1273_vm10 = vcmask 130112   ;;  %vm1280_vm11 = vcmask 195712  }
  0x14   :  { %606 = vmatpush1.bf16.msra.mxu0 %v1535_v12  ;;  %vm1287_vm12 = vcmask 261312   ;;  %vm1294_vm13 = vcmask 326912   ;;  %vm1301_vm14 = vcmask 392512   ;;  %vm1308_vm15 = vcmask 458112  }
  0x15   :  { %607 = vmatprep.subr.bf16.mxu0 %v1536_v13 }
  0x18   :  { %608 = vmatpush1.bf16.msra.mxu0 %v1538_v14 }
  0x19   :  { %609 = vmatprep.subr.bf16.mxu0 %v1539_v15 }
  0x1c   :  { %610 = vmatpush1.bf16.msra.mxu0 %v1541_v16  ;;  %v1547_v16 = vld [vmem:[%s2221_s4 + $0x18] sm:$0xff]  }
  0x1d   :  { %611 = vmatprep.subr.bf16.mxu0 %v1542_v17 }
  0x20   :  { %612 = vmatpush1.bf16.msra.mxu0 %v1544_v18  ;;  %v1584_v18 = vmov 0.0  }
  0x21   :  { %1501 = vmatprep.subr.bf16.mxu1 %v1584_v18  ;;  %1509 = vmatprep.mubr.msk.bf16.mxu1 %vm1585_vm7, %v1584_v18  ;;  %vm1364_vm7 = vcmask 982912  }
  0x22   :  { %1502 = vmatpush3.bf16.msra.mxu1 %v1547_v16 }
  0x23   :  { %1503 = vmatprep.subr.bf16.mxu1 %v1584_v18 }
  0x26   :  { %1504 = vmatpush3.bf16.msra.mxu1 %v1548_v19 }
  0x27   :  { %1505 = vmatprep.subr.bf16.mxu1 %v1584_v18 }
  0x7d   :  { %v490_v20 = vpop.permute.xlu0 %489 }
  0x7e   :  { %vm494_vm0 = vcmp.eq.s32.totalorder %v490_v20, %v1682_v21  ;;  %v1549_v20 = vld [vmem:[%s2221_s4 + $0x8] sm:$0xff]  }
  0x7f   :  { %1506 = vmatpush3.bf16.msra.mxu1 %v1549_v20 }
  0x80   :  { %1507 = vmatprep.subr.bf16.mxu1 %v1584_v18 }
  0x81   :  { %v493_v22 = vpop.permute.xlu0 %492 }
  0x82   :  { %vm495_vm1 = vcmp.eq.s32.totalorder %v493_v22, %v1682_v21  ;;  %v1550_v22 = vld [vmem:[%s2221_s4] sm:$0xff]  }
  0x83   :  { %vm1488_vm2 = vmpackc.low %vm495_vm1, %vm494_vm0  ;;  %1508 = vmatpush3.bf16.msra.mxu1 %v1550_v22  ;;  %vm1315_vm0 = vcmask 523712   ;;  %vm1322_vm1 = vcmask 589312  }
  0x84   :  { %1489 = vmatmul.mubr.msk.bf16.vlgmr.msra.gmra.mxu0 %vm1488_vm2, %v1582_v23  ;;  %v25_v23 = vld [vmem:[%s2217_s0] sm:$0x77]  ;;  %vm1329_vm2 = vcmask 654912  }
 0x144   :  { %v631_v26 = vpop.f32.mrf.mxu0 }
 0x145   :  { %v643_v27 = vrot.slane %v631_v26, %v1689_v25 }
 0x146   :  { %v1692_v28 = vpop.f32.mrf.mxu0 }
 0x147   :  { %645 = vrot.lane.b32.xlu1 %v643_v27, %s1583_s3  ;;  %v34_v27 = vsel %vm33_vm8, %v25_v23, 0.0 }
 0x148   :  { %v635_v29 = vpop.f32.mrf.mxu0 }
 0x149   :  { %v695_v30 = vrot.slane %v635_v29, %v1689_v25 }
 0x14b   :  { %697 = vrot.lane.b32.xlu1 %v695_v30, %s1583_s3  ;;  %v26_v30 = vld [vmem:[%s2217_s0 + $0x8] sm:$0x77] }
 0x1b9   :  { %v646_v31 = vpop.permute.xlu1 %645 }
 0x1ba   :  { %v648_v32 = vmul.f32 %v646_v31, %v631_v26  ;;  %v29_v26 = vcombine.high %v25_v23, %v25_v23 }
 0x1bc   :  { %650 = vrot.lane.b32.xlu0 %v648_v32, %s1583_s3  ;;  %v30_v32 = vcombine.high %v26_v30, %v26_v30 }
 0x1bd   :  { %v698_v33 = vpop.permute.xlu1 %697 }
 0x1be   :  { %v700_v34 = vmul.f32 %v698_v33, %v635_v29  ;;  %v35_v29 = vsel %vm33_vm8, %v29_v26, 0.0  ;;  %v39_v33 = vsel %vm33_vm8, %v26_v30, 0.0 }
 0x1bf   :  { %v36_v31 = vadd.f32 %v35_v29, %v34_v27 }
 0x1c0   :  { %702 = vrot.lane.b32.xlu1 %v700_v34, %s1583_s3  ;;  %v40_v34 = vsel %vm33_vm8, %v30_v32, 0.0  ;;  %vm1371_vm8 = vcmask 1048512  }
 0x22e   :  { %v651_v35 = vpop.permute.xlu0 %650 }
 0x22f   :  { %v654_v36 = vsel %vm653_vm3, %v651_v35, 0.0  ;;  %v41_v35 = vadd.f32 %v40_v34, %v39_v33 }
 0x230   :  { %655 = vadd.xlane.f32.xlu0 %v654_v36  ;;  %v47_v36 = vld [vmem:[%s2219_s2] sm:$0x7] }
 0x232   :  { %v703_v37 = vpop.permute.xlu1 %702 }
 0x233   :  { %v705_v38 = vsel %vm653_vm3, %v703_v37, 0.0  ;;  %v59_v37 = vrot.slane %v47_v36, %v1689_v25 }
 0x234   :  { %706 = vadd.xlane.f32.xlu1 %v705_v38  ;;  %v1726_v38 = vsub.s32 1, %v1686_v24 }
 0x2b9   :  { %v656_v39 = vpop.xlane.xlu0 %655 }
 0x2ba   :  { %v658_v40 = vsel %vm657_vm4, %v656_v39, -1e+30  ;;  %v183_v39 = vrot.slane %v47_v36, %v1726_v38  ;;  %vm1343_vm4 = vcmask 786112  }
 0x2bb   :  { %v660_v41 = vsel %vm659_vm5, %v658_v40, -inf }
 0x2bc   :  { %v661_v42 = vrot.slane %v660_v41, 4 }
 0x2bd   :  { %v707_v43 = vpop.xlane.xlu1 %706 }
 0x2be   :  { %v662_v44 = vmax.f32 %v660_v41, %v661_v42  ;;  %v709_v45 = vsel %vm708_vm6, %v707_v43, -1e+30  ;;  %vm1357_vm6 = vcmask 917312  }
 0x2bf   :  { %v710_v46 = vsel %vm659_vm5, %v709_v45, -inf }
 0x2c0   :  { %v663_v47 = vrot.slane %v662_v44, 2  ;;  %v711_v48 = vrot.slane %v710_v46, 4 }
 0x2c2   :  { %v664_v49 = vmax.f32 %v662_v44, %v663_v47  ;;  %v712_v50 = vmax.f32 %v710_v46, %v711_v48 }
 0x2c4   :  { %v665_v51 = vrot.slane %v664_v49, 1  ;;  %v713_v52 = vrot.slane %v712_v50, 2 }
 0x2c6   :  { %v666_v53 = vmax.f32 %v664_v49, %v665_v51  ;;  %v714_v54 = vmax.f32 %v712_v50, %v713_v52 }
 0x2c8   :  { %v667_v55 = vsub.f32 %v658_v40, %v666_v53  ;;  %v715_v56 = vrot.slane %v714_v54, 1  ;;  %v1730_v40 = vsub.s32 2, %v1686_v24 }
 0x2ca   :  { %v668_v57 = vmul.f32 1.442695, %v667_v55  ;;  %v716_v58 = vmax.f32 %v714_v54, %v715_v56  ;;  %v339_v41 = vrot.slane %v47_v36, %v1730_v40 }
 0x2cc   :  { %1551 = vpow2.f32 %v668_v57  ;;  %v717_v59 = vsub.f32 %v709_v45, %v716_v58  ;;  %v637_v45 = vpop.f32.mrf.mxu0 }
 0x2ce   :  { %v718_v60 = vmul.f32 1.442695, %v717_v59 }
 0x2d0   :  { %1553 = vpow2.f32 %v718_v60 }
 0x2d9   :  { %v1552_v61 = vpop.eup %1551 }
 0x2da   :  { %v670_v62 = vsel %vm659_vm5, %v1552_v61, 0.0 }
 0x2db   :  { %v671_v63 = vrot.slane %v670_v62, 4 }
 0x2dd   :  { %v1554_v0 = vpop.eup %1553  ;;  %v672_v1 = vadd.f32 %v671_v63, %v670_v62  ;;  %v1495_v62 = vld [vmem:[%s2222_s5] ss:$0 sm:$0xff]  ;;  %s1586_s5 = smov [#allocation2]  }
 0x2de   :  { %v720_v2 = vsel %vm659_vm5, %v1554_v0, 0.0  ;;  %vm1350_vm5 = vcmask 851712   ;;  %s1462_s20 = sshll.u32 %s1586_s5, 4  ;;  %s1463_s20 = int_to_ptr.vmem [resolvable:$true] %s1462_s20 }
 0x2df   :  { %v673_v3 = vrot.slane %v672_v1, 2  ;;  %v721_v4 = vrot.slane %v720_v2, 4  ;;  %s1559_s21 = scalar_lea.vmem %s1463_s20, 32  ;;  %p1564_p1 = scmp.lt.s32.totalorder %s1463_s20, %s1463_s20 }
 0x2e0   :  { %p1560_p0 = scmp.ne.s32.totalorder %s1463_s20, %s1559_s21  ;;  %p1565_p2 = scmp.lt.s32.totalorder %s1559_s21, %s1559_s21 }
 0x2e1   :  { %v674_v5 = vadd.f32 %v673_v3, %v672_v1  ;;  %v722_v6 = vadd.f32 %v721_v4, %v720_v2 }
 0x2e2   :  { %p1566_p3 = por %p1565_p2, %p1564_p1 }
 0x2e3   :  { %v675_v7 = vrot.slane %v674_v5, 1  ;;  %v723_v8 = vrot.slane %v722_v6, 2 }
 0x2e4   :  { %p1567_p4 = pnand %p1566_p3, %p1560_p0 }
 0x2e5   :  { %v676_v9 = vadd.f32 %v675_v7, %v674_v5  ;;  %v724_v10 = vadd.f32 %v723_v8, %v722_v6 }
 0x2e7   :  { %1555 = vrcp.f32 %v676_v9  ;;  %v725_v11 = vrot.slane %v724_v10, 1 }
 0x2e9   :  { %v726_v12 = vadd.f32 %v725_v11, %v724_v10 }
 0x2eb   :  { %1557 = vrcp.f32 %v726_v12 }
 0x2f4   :  { %v1556_v13 = vpop.eup %1555 }
 0x2f5   :  { %v678_v14 = vmul.f32 %v1556_v13, %v1552_v61 }
 0x2f7   :  { %681 = vperm.xlu0 %1519, %v678_v14  }
 0x2f8   :  { %v1558_v15 = vpop.eup %1557 }
 0x2f9   :  { %v728_v17 = vmul.f32 %v1558_v15, %v1554_v0 }
 0x2fb   :  { %731 = vperm.xlu1 %1520, %v728_v17  }
 0x316   :  { %37 = vadd.xlane.f32.xlu0 %v36_v31 }
 0x31f   :  { %42 = vadd.xlane.f32.xlu1 %v41_v35 }
 0x32c   :  { %62 = vbcast.lane.b32.xlu0 %v59_v37, 256 }
 0x330   :  { %66 = vbcast.lane.b32.xlu1 %v59_v37, 264  ;;  %70 = vbcast.lane.b32.xlu0 %v59_v37, 272 }
 0x334   :  { %74 = vbcast.lane.b32.xlu1 %v59_v37, 280  ;;  %78 = vbcast.lane.b32.xlu0 %v59_v37, 288 }
 0x338   :  { %82 = vbcast.lane.b32.xlu1 %v59_v37, 296  ;;  %86 = vbcast.lane.b32.xlu0 %v59_v37, 304 }
 0x33c   :  { %90 = vbcast.lane.b32.xlu1 %v59_v37, 312  ;;  %94 = vbcast.lane.b32.xlu0 %v59_v37, 320 }
 0x340   :  { %98 = vbcast.lane.b32.xlu1 %v59_v37, 328  ;;  %102 = vbcast.lane.b32.xlu0 %v59_v37, 336 }
 0x344   :  { %106 = vbcast.lane.b32.xlu1 %v59_v37, 344  ;;  %110 = vbcast.lane.b32.xlu0 %v59_v37, 352 }
 0x348   :  { %114 = vbcast.lane.b32.xlu1 %v59_v37, 360  ;;  %118 = vbcast.lane.b32.xlu0 %v59_v37, 368 }
 0x34c   :  { %122 = vbcast.lane.b32.xlu1 %v59_v37, 376  ;;  %186 = vbcast.lane.b32.xlu0 %v183_v39, 256 }
 0x350   :  { %190 = vbcast.lane.b32.xlu1 %v183_v39, 264  ;;  %194 = vbcast.lane.b32.xlu0 %v183_v39, 272 }
 0x354   :  { %198 = vbcast.lane.b32.xlu1 %v183_v39, 280  ;;  %202 = vbcast.lane.b32.xlu0 %v183_v39, 288 }
 0x358   :  { %206 = vbcast.lane.b32.xlu1 %v183_v39, 296  ;;  %210 = vbcast.lane.b32.xlu0 %v183_v39, 304 }
 0x35c   :  { %214 = vbcast.lane.b32.xlu1 %v183_v39, 312  ;;  %218 = vbcast.lane.b32.xlu0 %v183_v39, 320 }
 0x360   :  { %222 = vbcast.lane.b32.xlu1 %v183_v39, 328  ;;  %226 = vbcast.lane.b32.xlu0 %v183_v39, 336 }
 0x364   :  { %230 = vbcast.lane.b32.xlu1 %v183_v39, 344  ;;  %234 = vbcast.lane.b32.xlu0 %v183_v39, 352 }
 0x368   :  { %238 = vbcast.lane.b32.xlu1 %v183_v39, 360  ;;  %242 = vbcast.lane.b32.xlu0 %v183_v39, 368 }
 0x36c   :  { %246 = vbcast.lane.b32.xlu1 %v183_v39, 376  ;;  %342 = vbcast.lane.b32.xlu0 %v339_v41, 256 }
 0x370   :  { %346 = vbcast.lane.b32.xlu1 %v339_v41, 264  ;;  %350 = vbcast.lane.b32.xlu0 %v339_v41, 272 }
 0x372   :  { %v682_v42 = vpop.permute.xlu0 %681 }
 0x373   :  { %v684_v43 = vmul.f32 %v682_v42, %v1692_v28 }
 0x374   :  { %354 = vbcast.lane.b32.xlu1 %v339_v41, 280  ;;  %358 = vbcast.lane.b32.xlu0 %v339_v41, 288 }
 0x375   :  { %v685_v44 = vsel %vm653_vm3, %v684_v43, 0.0 }
 0x376   :  { %v686_v46 = vrot.slane %v685_v44, 4  ;;  %v732_v47 = vpop.permute.xlu1 %731 }
 0x377   :  { %v734_v48 = vmul.f32 %v732_v47, %v637_v45 }
 0x378   :  { %v687_v49 = vadd.f32 %v686_v46, %v685_v44  ;;  %362 = vbcast.lane.b32.xlu1 %v339_v41, 296  ;;  %366 = vbcast.lane.b32.xlu0 %v339_v41, 304 }
 0x379   :  { %v735_v50 = vsel %vm653_vm3, %v734_v48, 0.0 }
 0x37a   :  { %v688_v51 = vrot.slane %v687_v49, 2  ;;  %v736_v52 = vrot.slane %v735_v50, 4 }
 0x37c   :  { %v689_v53 = vadd.f32 %v688_v51, %v687_v49  ;;  %v737_v54 = vadd.f32 %v736_v52, %v735_v50  ;;  %370 = vbcast.lane.b32.xlu1 %v339_v41, 312  ;;  %374 = vbcast.lane.b32.xlu0 %v339_v41, 320 }
 0x37e   :  { %v738_v28 = vrot.slane %v737_v54, 2  ;;  %v690_v55 = vrot.slane %v689_v53, 1 }
 0x380   :  { %v739_v56 = vadd.f32 %v738_v28, %v737_v54  ;;  %378 = vbcast.lane.b32.xlu1 %v339_v41, 328  ;;  %382 = vbcast.lane.b32.xlu0 %v339_v41, 336  ;;  %v691_v58 = vadd.f32 %v690_v55, %v689_v53 }
 0x382   :  { %v740_v57 = vrot.slane %v739_v56, 1 }
 0x384   :  { %v741_v59 = vadd.f32 %v740_v57, %v739_v56  ;;  %386 = vbcast.lane.b32.xlu1 %v339_v41, 344  ;;  %390 = vbcast.lane.b32.xlu0 %v339_v41, 352 }
 0x386   :  { %v743_v60 = vsel %vm742_vm9, %v691_v58, %v741_v59  ;;  %vm1452_vm9 = vcmask 1041409  }
 0x387   :  { %v744_v61 = vpack.c.bf16 %v743_v60, %v743_v60 }
 0x388   :  { %394 = vbcast.lane.b32.xlu1 %v339_v41, 360  ;;  %398 = vbcast.lane.b32.xlu0 %v339_v41, 368 }
 0x389   :  { %1510 = vmatmul.mubr.msk.bf16.vlgmr.msra.gmra.mxu1 %vm653_vm3, %v744_v61  ;;  %vm1336_vm3 = vcmask 720512  }
 0x38c   :  { %402 = vbcast.lane.b32.xlu1 %v339_v41, 376  ;;  %1026 = vbcast.lane.b32.xlu0 %v1495_v62, 256 }
 0x390   :  { %1030 = vbcast.lane.b32.xlu1 %v1495_v62, 264  ;;  %1034 = vbcast.lane.b32.xlu0 %v1495_v62, 272 }
 0x394   :  { %1038 = vbcast.lane.b32.xlu1 %v1495_v62, 280  ;;  %1042 = vbcast.lane.b32.xlu0 %v1495_v62, 288 }
 0x398   :  { %1046 = vbcast.lane.b32.xlu1 %v1495_v62, 296  ;;  %1050 = vbcast.lane.b32.xlu0 %v1495_v62, 304 }
 0x39c   :  { %1054 = vbcast.lane.b32.xlu1 %v1495_v62, 312  ;;  %1058 = vbcast.lane.b32.xlu0 %v1495_v62, 320 }
 0x39f   :  { %v1740_v63 = vpop.xlane.xlu0 %37 }
 0x3a0   :  { %1062 = vbcast.lane.b32.xlu1 %v1495_v62, 328  ;;  %1066 = vbcast.lane.b32.xlu0 %v1495_v62, 336 }
 0x3a3   :  { %v1742_v0 = vpop.permute.xlu0 %62 }
 0x3a4   :  { %2269 = vst [vmem:[#allocation7_spill] sm:$0xff] %v1742_v0  ;;  %1070 = vbcast.lane.b32.xlu1 %v1495_v62, 344  ;;  %1074 = vbcast.lane.b32.xlu0 %v1495_v62, 352 }
 0x3a7   :  { %v1744_v1 = vpop.permute.xlu0 %70 }
 0x3a8   :  { %2270 = vst [vmem:[#allocation8_spill] sm:$0xff] %v1744_v1  ;;  %v43_v2 = vpop.xlane.xlu1 %42  ;;  %1078 = vbcast.lane.b32.xlu1 %v1495_v62, 360  ;;  %1082 = vbcast.lane.b32.xlu0 %v1495_v62, 368 }
 0x3a9   :  { %v46_v45 = vmul.f32 0.00390625, %v43_v2 }
 0x3ab   :  { %v1746_v3 = vpop.permute.xlu0 %78  ;;  %v1823_v48 = vrot.slane %v46_v45, %v1689_v25  ;;  %v1826_v49 = vrot.slane %v46_v45, %v1726_v38  ;;  %v1839_v28 = vrot.slane %v46_v45, %v1730_v40 }
 0x3ac   :  { %2271 = vst [vmem:[#allocation9_spill] sm:$0xff] %v1746_v3  ;;  %v1748_v4 = vpop.permute.xlu1 %66  ;;  %1086 = vbcast.lane.b32.xlu1 %v1495_v62, 376 }
 0x3ad   :  { %2272 = vst [vmem:[#allocation10_spill] sm:$0xff] %v1748_v4  ;;  %2287 = vst [vmem:[#allocation25_spill] sm:$0xff] %v1823_v48 }
 0x3ae   :  { %2288 = vst [vmem:[#allocation26_spill] sm:$0xff] %v1826_v49  ;;  %2290 = vst [vmem:[#allocation28_spill] sm:$0xff] %v1839_v28 }
 0x3af   :  { %v1750_v5 = vpop.permute.xlu0 %86 }
 0x3b0   :  { %2273 = vst [vmem:[#allocation11_spill] sm:$0xff] %v1750_v5  ;;  %v1752_v6 = vpop.permute.xlu1 %74 }
 0x3b1   :  { %2274 = vst [vmem:[#allocation12_spill] sm:$0xff] %v1752_v6 }
 0x3b3   :  { %v1754_v7 = vpop.permute.xlu0 %94 }
 0x3b4   :  { %v1756_v8 = vpop.permute.xlu1 %82 }
 0x3b5   :  { %2275 = vst [vmem:[#allocation13_spill] sm:$0xff] %v1756_v8 }
 0x3b7   :  { %v1758_v9 = vpop.permute.xlu0 %102 }
 0x3b8   :  { %v1760_v10 = vpop.permute.xlu1 %90 }
 0x3bb   :  { %v1762_v11 = vpop.permute.xlu0 %110 }
 0x3bc   :  { %v1764_v12 = vpop.permute.xlu1 %98 }
 0x3bf   :  { %v1766_v13 = vpop.permute.xlu0 %118 }
 0x3c0   :  { %v1768_v14 = vpop.permute.xlu1 %106  ;;  %v170_v52 = vmul.f32 %v1766_v13, %v1823_v48 }
 0x3c3   :  { %v1770_v15 = vpop.permute.xlu0 %186 }
 0x3c4   :  { %2276 = vst [vmem:[#allocation14_spill] sm:$0xff] %v1770_v15  ;;  %v1772_v16 = vpop.permute.xlu1 %114 }
 0x3c7   :  { %v1774_v17 = vpop.permute.xlu0 %194 }
 0x3c8   :  { %2277 = vst [vmem:[#allocation15_spill] sm:$0xff] %v1774_v17  ;;  %v1776_v18 = vpop.permute.xlu1 %122 }
 0x3c9   :  { %v171_v61 = vmul.f32 %v1776_v18, %v1823_v48 }
 0x3cb   :  { %v1778_v19 = vpop.permute.xlu0 %202 }
 0x3cc   :  { %2278 = vst [vmem:[#allocation16_spill] sm:$0xff] %v1778_v19  ;;  %v1780_v20 = vpop.permute.xlu1 %190 }
 0x3cd   :  { %2279 = vst [vmem:[#allocation17_spill] sm:$0xff] %v1780_v20 }
 0x3cf   :  { %v1782_v22 = vpop.permute.xlu0 %210 }
 0x3d0   :  { %v1784_v23 = vpop.permute.xlu1 %198 }
 0x3d1   :  { %2280 = vst [vmem:[#allocation18_spill] sm:$0xff] %v1784_v23 }
 0x3d3   :  { %v1786_v26 = vpop.permute.xlu0 %218 }
 0x3d4   :  { %2281 = vst [vmem:[#allocation19_spill] sm:$0xff] %v1786_v26  ;;  %v1788_v27 = vpop.permute.xlu1 %206 }
 0x3d5   :  { %2282 = vst [vmem:[#allocation20_spill] sm:$0xff] %v1788_v27 }
 0x3d7   :  { %v1790_v29 = vpop.permute.xlu0 %226 }
 0x3d8   :  { %v1792_v30 = vpop.permute.xlu1 %214 }
 0x3db   :  { %v1794_v31 = vpop.permute.xlu0 %234 }
 0x3dc   :  { %v1796_v32 = vpop.permute.xlu1 %222 }
 0x3df   :  { %v1798_v33 = vpop.permute.xlu0 %242 }
 0x3e0   :  { %v1800_v34 = vpop.permute.xlu1 %230  ;;  %v294_v53 = vmul.f32 %v1798_v33, %v1826_v49 }
 0x3e2   :  { %v326_v56 = vadd.f32 %v294_v53, %v170_v52 }
 0x3e3   :  { %v1802_v35 = vpop.permute.xlu0 %342 }
 0x3e4   :  { %2283 = vst [vmem:[#allocation21_spill] sm:$0xff] %v1802_v35  ;;  %v1804_v36 = vpop.permute.xlu1 %238 }
 0x3e7   :  { %v1806_v37 = vpop.permute.xlu0 %350 }
 0x3e8   :  { %2284 = vst [vmem:[#allocation22_spill] sm:$0xff] %v1806_v37  ;;  %v1808_v39 = vpop.permute.xlu1 %246 }
 0x3e9   :  { %2285 = vst [vmem:[#allocation23_spill] sm:$0xff] %v1808_v39  ;;  %v295_v62 = vmul.f32 %v1808_v39, %v1826_v49 }
 0x3eb   :  { %v1810_v41 = vpop.permute.xlu0 %358  ;;  %v327_v45 = vadd.f32 %v295_v62, %v171_v61 }
 0x3ec   :  { %v1812_v42 = vpop.permute.xlu1 %346 }
 0x3ed   :  { %2286 = vst [vmem:[#allocation24_spill] sm:$0xff] %v1812_v42 }
 0x3ef   :  { %v1814_v43 = vpop.permute.xlu0 %366 }
 0x3f0   :  { %v1816_v44 = vpop.permute.xlu1 %354 }
 0x3f3   :  { %v1818_v46 = vpop.permute.xlu0 %374 }
 0x3f4   :  { %v1820_v47 = vpop.permute.xlu1 %362 }
 0x3f7   :  { %v1828_v50 = vpop.permute.xlu0 %382 }
 0x3f8   :  { %v1830_v51 = vpop.permute.xlu1 %370 }
 0x3fb   :  { %v1836_v54 = vpop.permute.xlu0 %390 }
 0x3fc   :  { %2289 = vst [vmem:[#allocation27_spill] sm:$0xff] %v1836_v54  ;;  %v1841_v55 = vpop.permute.xlu1 %378 }
 0x3ff   :  { %v1843_v57 = vpop.permute.xlu0 %398 }
 0x400   :  { %2291 = vst [vmem:[#allocation29_spill] sm:$0xff] %v1843_v57  ;;  %v1845_v58 = vpop.permute.xlu1 %386  ;;  %v450_v59 = vmul.f32 %v1843_v57, %v1839_v28 }
 0x401   :  { %2292 = vst [vmem:[#allocation30_spill] sm:$0xff] %v1845_v58 }
 0x402   :  { %v1849_v60 = vadd.f32 %v450_v59, %v326_v56 }
 0x404   :  { %2293 = vst [vmem:[#allocation31_spill] sm:$0xff] %v1849_v60  ;;  %v1855_v2 = vpop.permute.xlu1 %394 }
 0x405   :  { %2294 = vst [vmem:[#allocation32_spill] sm:$0xff] %v1855_v2 }
 0x408   :  { %v1857_v24 = vpop.permute.xlu1 %402 }
 0x409   :  { %2295 = vst [vmem:[#allocation33_spill] sm:$0xff] %v1857_v24  ;;  %v451_v52 = vmul.f32 %v1857_v24, %v1839_v28 }
 0x40b   :  { %v1861_v53 = vadd.f32 %v451_v52, %v327_v45 }
 0x40d   :  { %2296 = vst [vmem:[#allocation34_spill] sm:$0xff] %v1861_v53 }
 0x449   :  { %v814_v21 = vpop.f32.mrf.mxu1 }
 0x44a   :  { %v824_v56 = vrot.slane %v814_v21, %v1689_v25  ;;  %v891_v61 = vrot.slane %v814_v21, %v1726_v38 }
 0x44b   :  { %v1511_v59 = vpop.f32.mrf.mxu1 }
 0x44c   :  { %830 = vbcast.lane.b32.xlu1 %v824_v56, 264  ;;  %826 = vbcast.lane.b32.xlu0 %v824_v56, 256 }
 0x44d   :  { %v817_v60 = vpop.f32.mrf.mxu1 }
 0x44e   :  { %v1867_v60 = vpop.permute.xlu0 %1026 }
 0x44f   :  { %v1512_v57 = vpop.f32.mrf.mxu1 }
 0x450   :  { %838 = vbcast.lane.b32.xlu1 %v824_v56, 280  ;;  %834 = vbcast.lane.b32.xlu0 %v824_v56, 272  ;;  %v1865_v57 = vpop.permute.xlu1 %1030 }
 0x452   :  { %v1871_v62 = vpop.permute.xlu0 %1034 }
 0x454   :  { %846 = vbcast.lane.b32.xlu1 %v824_v56, 296  ;;  %842 = vbcast.lane.b32.xlu0 %v824_v56, 288  ;;  %v1869_v21 = vpop.permute.xlu1 %1038 }
 0x456   :  { %v1875_v52 = vpop.permute.xlu0 %1042 }
 0x458   :  { %854 = vbcast.lane.b32.xlu1 %v824_v56, 312  ;;  %850 = vbcast.lane.b32.xlu0 %v824_v56, 304  ;;  %v1873_v45 = vpop.permute.xlu1 %1046 }
 0x45a   :  { %v1879_v59 = vpop.permute.xlu0 %1050 }
 0x45b   :  { %2298 = vst [vmem:[#allocation36_spill] sm:$0xff] %v1879_v59 }
 0x45c   :  { %862 = vbcast.lane.b32.xlu1 %v824_v56, 328  ;;  %858 = vbcast.lane.b32.xlu0 %v824_v56, 320 }
 0x45e   :  { %v1883_v28 = vpop.permute.xlu0 %1058 }
 0x45f   :  { %2300 = vst [vmem:[#allocation38_spill] sm:$0xff] %v1883_v28 }
 0x460   :  { %870 = vbcast.lane.b32.xlu1 %v824_v56, 344  ;;  %866 = vbcast.lane.b32.xlu0 %v824_v56, 336 }
 0x462   :  { %v1888_v49 = vpop.permute.xlu0 %1066 }
 0x463   :  { %2302 = vst [vmem:[#allocation40_spill] sm:$0xff] %v1888_v49 }
 0x464   :  { %878 = vbcast.lane.b32.xlu1 %v824_v56, 360  ;;  %874 = vbcast.lane.b32.xlu0 %v824_v56, 352 }
 0x466   :  { %v1898_v39 = vpop.permute.xlu0 %1074 }
 0x467   :  { %2304 = vst [vmem:[#allocation42_spill] sm:$0xff] %v1898_v39 }
 0x468   :  { %886 = vbcast.lane.b32.xlu1 %v824_v56, 376  ;;  %882 = vbcast.lane.b32.xlu0 %v824_v56, 368  ;;  %v1877_v56 = vpop.permute.xlu1 %1054 }
 0x469   :  { %2297 = vst [vmem:[#allocation35_spill] sm:$0xff] %v1877_v56 }
 0x46c   :  { %897 = vbcast.lane.b32.xlu1 %v891_v61, 264  ;;  %893 = vbcast.lane.b32.xlu0 %v891_v61, 256  ;;  %v1881_v53 = vpop.permute.xlu1 %1062 }
 0x46d   :  { %2299 = vst [vmem:[#allocation37_spill] sm:$0xff] %v1881_v53 }
 0x470   :  { %905 = vbcast.lane.b32.xlu1 %v891_v61, 280  ;;  %901 = vbcast.lane.b32.xlu0 %v891_v61, 272  ;;  %v1886_v24 = vpop.permute.xlu1 %1070 }
 0x471   :  { %2301 = vst [vmem:[#allocation39_spill] sm:$0xff] %v1886_v24 }
 0x474   :  { %913 = vbcast.lane.b32.xlu1 %v891_v61, 296  ;;  %909 = vbcast.lane.b32.xlu0 %v891_v61, 288  ;;  %v1896_v54 = vpop.permute.xlu1 %1078 }
 0x475   :  { %2303 = vst [vmem:[#allocation41_spill] sm:$0xff] %v1896_v54 }
 0x478   :  { %921 = vbcast.lane.b32.xlu1 %v891_v61, 312  ;;  %917 = vbcast.lane.b32.xlu0 %v891_v61, 304 }
 0x47c   :  { %929 = vbcast.lane.b32.xlu1 %v891_v61, 328  ;;  %925 = vbcast.lane.b32.xlu0 %v891_v61, 320 }
 0x480   :  { %937 = vbcast.lane.b32.xlu1 %v891_v61, 344  ;;  %933 = vbcast.lane.b32.xlu0 %v891_v61, 336 }
 0x484   :  { %945 = vbcast.lane.b32.xlu1 %v891_v61, 360  ;;  %941 = vbcast.lane.b32.xlu0 %v891_v61, 352 }
 0x488   :  { %953 = vbcast.lane.b32.xlu1 %v891_v61, 376  ;;  %949 = vbcast.lane.b32.xlu0 %v891_v61, 368  ;;  %v45_v61 = vmul.f32 0.00390625, %v1740_v63 }
 0x48a   :  { %v1891_v48 = vrot.slane %v45_v61, %v1689_v25  ;;  %v1894_v2 = vrot.slane %v45_v61, %v1726_v38  ;;  %v1905_v24 = vrot.slane %v45_v61, %v1730_v40 }
 0x48c   :  { %v140_v53 = vmul.f32 %v1742_v0, %v1891_v48  ;;  %v264_v63 = vmul.f32 %v1770_v15, %v1894_v2  ;;  %v141_v25 = vmul.f32 %v1748_v4, %v1891_v48  ;;  %v265_v38 = vmul.f32 %v1780_v20, %v1894_v2  ;;  %v1917_v0 = vpop.permute.xlu1 %1086  ;;  %v1919_v15 = vpop.permute.xlu0 %1082 }
 0x48d   :  { %v143_v54 = vmul.f32 %v1752_v6, %v1891_v48  ;;  %v142_v39 = vmul.f32 %v1744_v1, %v1891_v48  ;;  %v266_v49 = vmul.f32 %v1774_v17, %v1894_v2  ;;  %2305 = vst [vmem:[#allocation43_spill] sm:$0xff] %v1917_v0  ;;  %2306 = vst [vmem:[#allocation44_spill] sm:$0xff] %v1919_v15 }
 0x48e   :  { %v296_v40 = vadd.f32 %v264_v63, %v140_v53  ;;  %v267_v61 = vmul.f32 %v1784_v23, %v1894_v2  ;;  %v421_v20 = vmul.f32 %v1812_v42, %v1905_v24  ;;  %v420_v6 = vmul.f32 %v1802_v35, %v1905_v24 }
 0x48f   :  { %v297_v4 = vadd.f32 %v265_v38, %v141_v25  ;;  %v144_v1 = vmul.f32 %v1746_v3, %v1891_v48  ;;  %v268_v17 = vmul.f32 %v1778_v19, %v1894_v2  ;;  %v145_v15 = vmul.f32 %v1756_v8, %v1891_v48 }
 0x490   :  { %v269_v53 = vmul.f32 %v1788_v27, %v1894_v2  ;;  %v422_v63 = vmul.f32 %v1806_v37, %v1905_v24  ;;  %v298_v0 = vadd.f32 %v266_v49, %v142_v39  ;;  %v423_v35 = vmul.f32 %v1816_v44, %v1905_v24 }
 0x491   :  { %v453_v25 = vadd.f32 %v421_v20, %v297_v4  ;;  %v452_v38 = vadd.f32 %v420_v6, %v296_v40  ;;  %v299_v42 = vadd.f32 %v267_v61, %v143_v54  ;;  %v147_v3 = vmul.f32 %v1760_v10, %v1891_v48 }
 0x492   :  { %v146_v19 = vmul.f32 %v1750_v5, %v1891_v48  ;;  %v270_v27 = vmul.f32 %v1782_v22, %v1894_v2  ;;  %v300_v39 = vadd.f32 %v268_v17, %v144_v1  ;;  %v271_v49 = vmul.f32 %v1792_v30, %v1894_v2 }
 0x493   :  { %v424_v4 = vmul.f32 %v1810_v41, %v1905_v24  ;;  %v454_v6 = vadd.f32 %v422_v63, %v298_v0  ;;  %v301_v20 = vadd.f32 %v269_v53, %v145_v15  ;;  %v425_v54 = vmul.f32 %v1820_v47, %v1905_v24 }
 0x494   :  { %v455_v5 = vadd.f32 %v423_v35, %v299_v42  ;;  %v148_v1 = vmul.f32 %v1754_v7, %v1891_v48  ;;  %v272_v17 = vmul.f32 %v1786_v26, %v1894_v2  ;;  %v302_v63 = vadd.f32 %v270_v27, %v146_v19 }
 0x495   :  { %v426_v35 = vmul.f32 %v1814_v43, %v1905_v24  ;;  %v456_v42 = vadd.f32 %v424_v4, %v300_v39  ;;  %v150_v19 = vmul.f32 %v1758_v9, %v1891_v48  ;;  %v275_v4 = vmul.f32 %v1800_v34, %v1894_v2 }
 0x4be   :  { %v831_v8 = vpop.permute.xlu1 %830  ;;  %v827_v23 = vpop.permute.xlu0 %826 }
 0x4bf   :  { %v988_v28 = vadd.f32 %v831_v8, %v453_v25  ;;  %v987_v37 = vadd.f32 %v827_v23, %v452_v38  ;;  %v149_v8 = vmul.f32 %v1764_v12, %v1891_v48  ;;  %v427_v25 = vmul.f32 %v1830_v51, %v1905_v24 }
 0x4c1   :  { %v1105_v40 = vadd.f32 %v1865_v57, %v988_v28  ;;  %v1104_v61 = vadd.f32 %v1867_v60, %v987_v37  ;;  %v273_v37 = vmul.f32 %v1796_v32, %v1894_v2  ;;  %v303_v28 = vadd.f32 %v271_v49, %v147_v3 }
 0x4c2   :  { %v839_v23 = vpop.permute.xlu1 %838  ;;  %v835_v0 = vpop.permute.xlu0 %834  ;;  %v274_v3 = vmul.f32 %v1790_v29, %v1894_v2 }
 0x4c3   :  { %v990_v15 = vadd.f32 %v839_v23, %v455_v5  ;;  %v989_v53 = vadd.f32 %v835_v0, %v454_v6  ;;  %1172 = vperm.xlu1 %1520, %v1105_v40   ;;  %1169 = vperm.xlu0 %1519, %v1104_v61   ;;  %v457_v5 = vadd.f32 %v425_v54, %v301_v20 }
 0x4c4   :  { %v151_v6 = vmul.f32 %v1768_v14, %v1891_v48  ;;  %v304_v61 = vadd.f32 %v272_v17, %v148_v1  ;;  %v428_v20 = vmul.f32 %v1818_v46, %v1905_v24  ;;  %v458_v54 = vadd.f32 %v426_v35, %v302_v63 }
 0x4c5   :  { %v1107_v38 = vadd.f32 %v1869_v21, %v990_v15  ;;  %v1106_v26 = vadd.f32 %v1871_v62, %v989_v53  ;;  %v305_v23 = vadd.f32 %v273_v37, %v149_v8  ;;  %v429_v0 = vmul.f32 %v1841_v55, %v1905_v24 }
 0x4c6   :  { %v847_v27 = vpop.permute.xlu1 %846  ;;  %v843_v40 = vpop.permute.xlu0 %842  ;;  %v459_v15 = vadd.f32 %v427_v25, %v303_v28  ;;  %v153_v53 = vmul.f32 %v1772_v16, %v1891_v48  ;;  %v306_v35 = vadd.f32 %v274_v3, %v150_v19  ;;  %v430_v28 = vmul.f32 %v1828_v50, %v1905_v24 }
 0x4c7   :  { %v992_v39 = vadd.f32 %v847_v27, %v457_v5  ;;  %v991_v49 = vadd.f32 %v843_v40, %v456_v42  ;;  %1178 = vperm.xlu1 %1520, %v1107_v38   ;;  %1175 = vperm.xlu0 %1519, %v1106_v26   ;;  %v152_v26 = vmul.f32 %v1762_v11, %v1891_v48 }
 0x4c8   :  { %v276_v42 = vmul.f32 %v1794_v31, %v1894_v2  ;;  %v277_v5 = vmul.f32 %v1804_v36, %v1894_v2  ;;  %v460_v25 = vadd.f32 %v428_v20, %v304_v61  ;;  %v307_v27 = vadd.f32 %v275_v4, %v151_v6  ;;  %v2307_v20 = vld [vmem:[#allocation23_spill] sm:$0xff] }
 0x4c9   :  { %v1109_v1 = vadd.f32 %v1873_v45, %v992_v39  ;;  %v1108_v17 = vadd.f32 %v1875_v52, %v991_v49  ;;  %v431_v40 = vmul.f32 %v1845_v58, %v1905_v24  ;;  %v154_v19 = vmul.f32 %v1766_v13, %v1891_v48  ;;  %v2309_v13 = vld [vmem:[#allocation32_spill] sm:$0xff] }
 0x4ca   :  { %v855_v38 = vpop.permute.xlu1 %854  ;;  %v851_v63 = vpop.permute.xlu0 %850  ;;  %v278_v6 = vmul.f32 %v1798_v33, %v1894_v2 }
 0x4cb   :  { %v994_v8 = vadd.f32 %v855_v38, %v459_v15  ;;  %v993_v37 = vadd.f32 %v851_v63, %v458_v54  ;;  %1184 = vperm.xlu1 %1520, %v1109_v1   ;;  %1181 = vperm.xlu0 %1519, %v1108_v17   ;;  %v461_v15 = vadd.f32 %v429_v0, %v305_v23  ;;  %v2308_v23 = vld [vmem:[#allocation27_spill] sm:$0xff] }
 0x4cc   :  { %v155_v54 = vmul.f32 %v1776_v18, %v1891_v48  ;;  %v308_v17 = vadd.f32 %v276_v42, %v152_v26  ;;  %v279_v38 = vmul.f32 %v2307_v20, %v1894_v2  ;;  %v432_v0 = vmul.f32 %v2308_v23, %v1905_v24  ;;  %v2311_v42 = vld [vmem:[#allocation38_spill] sm:$0xff] }
 0x4cd   :  { %v1111_v39 = vadd.f32 %v1877_v56, %v994_v8  ;;  %v1110_v49 = vadd.f32 %v1879_v59, %v993_v37  ;;  %v462_v18 = vadd.f32 %v430_v28, %v306_v35  ;;  %v309_v63 = vadd.f32 %v277_v5, %v153_v53  ;;  %v2310_v8 = vld [vmem:[#allocation37_spill] sm:$0xff]  ;;  %v2315_v2 = vld [vmem:[#allocation26_spill] sm:$0xff]  ;;  %v2321_v59 = vld [vmem:[#allocation40_spill] sm:$0xff] }
 0x4ce   :  { %v863_v3 = vpop.permute.xlu1 %862  ;;  %v859_v1 = vpop.permute.xlu0 %858  ;;  %v433_v48 = vmul.f32 %v2309_v13, %v1905_v24  ;;  %v463_v33 = vadd.f32 %v431_v40, %v307_v27  ;;  %v2317_v53 = vld [vmem:[#allocation17_spill] sm:$0xff]  ;;  %v310_v27 = vadd.f32 %v278_v6, %v154_v19 }
 0x4cf   :  { %v996_v61 = vadd.f32 %v863_v3, %v461_v15  ;;  %v995_v4 = vadd.f32 %v859_v1, %v460_v25  ;;  %1190 = vperm.xlu1 %1520, %v1111_v39   ;;  %1187 = vperm.xlu0 %1519, %v1110_v49   ;;  %v2312_v15 = vld [vmem:[#allocation25_spill] sm:$0xff]  ;;  %v2313_v25 = vld [vmem:[#allocation10_spill] sm:$0xff]  ;;  %v2314_v49 = vld [vmem:[#allocation7_spill] sm:$0xff]  ;;  %v281_v5 = vmul.f32 %v2317_v53, %v2315_v2 }
 0x4d0   :  { %v157_v39 = vmul.f32 %v2313_v25, %v2312_v15  ;;  %v156_v3 = vmul.f32 %v2314_v49, %v2312_v15  ;;  %v2316_v1 = vld [vmem:[#allocation14_spill] sm:$0xff]  ;;  %v2318_v40 = vld [vmem:[#allocation29_spill] sm:$0xff]  ;;  %v464_v25 = vadd.f32 %v432_v0, %v308_v17  ;;  %v465_v58 = vadd.f32 %v433_v48, %v309_v63  ;;  %v2322_v53 = vld [vmem:[#allocation12_spill] sm:$0xff] }
 0x4d1   :  { %v1113_v26 = vadd.f32 %v2310_v8, %v996_v61  ;;  %v1112_v37 = vadd.f32 %v2311_v42, %v995_v4  ;;  %v280_v20 = vmul.f32 %v2316_v1, %v2315_v2  ;;  %v311_v61 = vadd.f32 %v279_v38, %v155_v54  ;;  %v2319_v49 = vld [vmem:[#allocation33_spill] sm:$0xff]  ;;  %v2320_v8 = vld [vmem:[#allocation39_spill] sm:$0xff]  ;;  %v2326_v63 = vld [vmem:[#allocation28_spill] sm:$0xff] }
 0x4d2   :  { %v871_v23 = vpop.permute.xlu1 %870  ;;  %v867_v35 = vpop.permute.xlu0 %866  ;;  %v434_v4 = vmul.f32 %v2318_v40, %v1905_v24  ;;  %v435_v42 = vmul.f32 %v2319_v49, %v1905_v24  ;;  %v2324_v54 = vld [vmem:[#allocation15_spill] sm:$0xff]  ;;  %v2327_v48 = vld [vmem:[#allocation24_spill] sm:$0xff]  ;;  %v313_v40 = vadd.f32 %v281_v5, %v157_v39  ;;  %v2329_v49 = vld [vmem:[#allocation41_spill] sm:$0xff] }
 0x4d3   :  { %v998_v28 = vadd.f32 %v871_v23, %v463_v33  ;;  %v997_v13 = vadd.f32 %v867_v35, %v462_v18  ;;  %1196 = vperm.xlu1 %1520, %v1113_v26   ;;  %1193 = vperm.xlu0 %1519, %v1112_v37   ;;  %v159_v23 = vmul.f32 %v2322_v53, %v2312_v15  ;;  %v2323_v18 = vld [vmem:[#allocation8_spill] sm:$0xff]  ;;  %v2325_v37 = vld [vmem:[#allocation18_spill] sm:$0xff]  ;;  %v2328_v35 = vld [vmem:[#allocation21_spill] sm:$0xff] }
 0x4d4   :  { %v158_v26 = vmul.f32 %v2323_v18, %v2312_v15  ;;  %v282_v19 = vmul.f32 %v2324_v54, %v2315_v2  ;;  %v312_v24 = vadd.f32 %v280_v20, %v156_v3  ;;  %v437_v33 = vmul.f32 %v2327_v48, %v2326_v63  ;;  %v2330_v18 = vld [vmem:[#allocation42_spill] sm:$0xff]  ;;  %v2332_v3 = vld [vmem:[#allocation9_spill] sm:$0xff]  ;;  %v2334_v5 = vld [vmem:[#allocation20_spill] sm:$0xff] }
 0x4d5   :  { %v1115_v1 = vadd.f32 %v2320_v8, %v998_v28  ;;  %v1114_v56 = vadd.f32 %v2321_v59, %v997_v13  ;;  %v283_v13 = vmul.f32 %v2325_v37, %v2315_v2  ;;  %v436_v28 = vmul.f32 %v2328_v35, %v2326_v63  ;;  %v2333_v37 = vld [vmem:[#allocation16_spill] sm:$0xff] }
 0x4d6   :  { %v879_v6 = vpop.permute.xlu1 %878  ;;  %v875_v38 = vpop.permute.xlu0 %874  ;;  %v467_v59 = vadd.f32 %v435_v42, %v311_v61  ;;  %v160_v20 = vmul.f32 %v2332_v3, %v2312_v15  ;;  %v284_v48 = vmul.f32 %v2333_v37, %v2315_v2  ;;  %v285_v42 = vmul.f32 %v2334_v5, %v2315_v2  ;;  %v2335_v61 = vld [vmem:[#allocation22_spill] sm:$0xff] }
 0x4d7   :  { %v1000_v17 = vadd.f32 %v879_v6, %v465_v58  ;;  %v999_v0 = vadd.f32 %v875_v38, %v464_v25  ;;  %1202 = vperm.xlu1 %1520, %v1115_v1   ;;  %1199 = vperm.xlu0 %1519, %v1114_v56   ;;  %v466_v58 = vadd.f32 %v434_v4, %v310_v27  ;;  %v2331_v25 = vld [vmem:[#allocation13_spill] sm:$0xff] }
 0x4d8   :  { %v161_v56 = vmul.f32 %v2331_v25, %v2312_v15  ;;  %v314_v38 = vadd.f32 %v282_v19, %v158_v26  ;;  %v438_v27 = vmul.f32 %v2335_v61, %v2326_v63  ;;  %v468_v4 = vadd.f32 %v436_v28, %v312_v24  ;;  %v2336_v25 = vld [vmem:[#allocation43_spill] sm:$0xff]  ;;  %v2337_v19 = vld [vmem:[#allocation44_spill] sm:$0xff] }
 0x4d9   :  { %v1117_v53 = vadd.f32 %v2329_v49, %v1000_v17  ;;  %v1116_v54 = vadd.f32 %v2330_v18, %v999_v0  ;;  %v315_v17 = vadd.f32 %v283_v13, %v159_v23  ;;  %v439_v0 = vmul.f32 %v1816_v44, %v2326_v63 }
 0x4da   :  { %v887_v1 = vpop.permute.xlu1 %886  ;;  %v883_v6 = vpop.permute.xlu0 %882  ;;  %v469_v37 = vadd.f32 %v437_v33, %v313_v40  ;;  %v316_v44 = vadd.f32 %v284_v48, %v160_v20  ;;  %v287_v28 = vmul.f32 %v1792_v30, %v2315_v2  ;;  %v440_v33 = vmul.f32 %v1810_v41, %v2326_v63  ;;  %v2339_v41 = vld [vmem:[#allocation19_spill] sm:$0xff] }
 0x4db   :  { %v1002_v35 = vadd.f32 %v887_v1, %v467_v59  ;;  %v1001_v39 = vadd.f32 %v883_v6, %v466_v58  ;;  %1208 = vperm.xlu1 %1520, %v1117_v53   ;;  %1205 = vperm.xlu0 %1519, %v1116_v54   ;;  %v163_v59 = vmul.f32 %v1760_v10, %v2312_v15  ;;  %v2338_v53 = vld [vmem:[#allocation11_spill] sm:$0xff] }
 0x4dc   :  { %v162_v54 = vmul.f32 %v2338_v53, %v2312_v15  ;;  %v286_v58 = vmul.f32 %v1782_v22, %v2315_v2  ;;  %v470_v10 = vadd.f32 %v438_v27, %v314_v38  ;;  %v317_v40 = vadd.f32 %v285_v42, %v161_v56 }
 0x4dd   :  { %v1119_v26 = vadd.f32 %v2336_v25, %v1002_v35  ;;  %v1118_v3 = vadd.f32 %v2337_v19, %v1001_v39  ;;  %v441_v6 = vmul.f32 %v1820_v47, %v2326_v63  ;;  %v471_v39 = vadd.f32 %v439_v0, %v315_v17 }
 0x4de   :  { %v898_v1 = vpop.permute.xlu1 %897  ;;  %v894_v24 = vpop.permute.xlu0 %893  ;;  %v165_v5 = vmul.f32 %v1764_v12, %v2312_v15  ;;  %v164_v20 = vmul.f32 %v1754_v7, %v2312_v15  ;;  %v318_v61 = vadd.f32 %v286_v58, %v162_v54  ;;  %v288_v56 = vmul.f32 %v2339_v41, %v2315_v2  ;;  %v2345_v41 = vld [vmem:[#allocation37_spill] sm:$0xff] }
 0x4df   :  { %v1004_v23 = vadd.f32 %v898_v1, %v469_v37  ;;  %v1003_v13 = vadd.f32 %v894_v24, %v468_v4  ;;  %1214 = vperm.xlu1 %1520, %v1119_v26   ;;  %1211 = vperm.xlu0 %1519, %v1118_v3   ;;  %v289_v47 = vmul.f32 %v1796_v32, %v2315_v2 }
 0x4e0   :  { %v472_v12 = vadd.f32 %v440_v33, %v316_v44  ;;  %v443_v7 = vmul.f32 %v1830_v51, %v2326_v63  ;;  %v473_v17 = vadd.f32 %v441_v6, %v317_v40  ;;  %v167_v0 = vmul.f32 %v1768_v14, %v2312_v15  ;;  %v2341_v33 = vld [vmem:[#allocation35_spill] sm:$0xff]  ;;  %v2342_v40 = vld [vmem:[#allocation36_spill] sm:$0xff] }
 0x4e1   :  { %v1121_v22 = vadd.f32 %v1865_v57, %v1004_v23  ;;  %v1120_v35 = vadd.f32 %v1867_v60, %v1003_v13  ;;  %v442_v57 = vmul.f32 %v1814_v43, %v2326_v63  ;;  %v319_v60 = vadd.f32 %v287_v28, %v163_v59 }
 0x4e2   :  { %v906_v30 = vpop.permute.xlu1 %905  ;;  %v902_v48 = vpop.permute.xlu0 %901  ;;  %v166_v26 = vmul.f32 %v1758_v9, %v2312_v15  ;;  %v290_v32 = vmul.f32 %v1790_v29, %v2315_v2  ;;  %v320_v51 = vadd.f32 %v288_v56, %v164_v20  ;;  %v321_v53 = vadd.f32 %v289_v47, %v165_v5 }
 0x4e3   :  { %v1006_v38 = vadd.f32 %v906_v30, %v471_v39  ;;  %v1005_v42 = vadd.f32 %v902_v48, %v470_v10  ;;  %1220 = vperm.xlu1 %1520, %v1121_v22   ;;  %1217 = vperm.xlu0 %1519, %v1120_v35   ;;  %v474_v14 = vadd.f32 %v442_v57, %v318_v61  ;;  %v2344_v48 = vld [vmem:[#allocation32_spill] sm:$0xff] }
 0x4e4   :  { %v445_v9 = vmul.f32 %v1841_v55, %v2326_v63  ;;  %v475_v58 = vadd.f32 %v443_v7, %v319_v60  ;;  %v169_v1 = vmul.f32 %v1772_v16, %v2312_v15  ;;  %v168_v24 = vmul.f32 %v1762_v11, %v2312_v15  ;;  %v2340_v11 = vld [vmem:[#allocation30_spill] sm:$0xff] }
 0x4e5   :  { %v1123_v27 = vadd.f32 %v1869_v21, %v1006_v38  ;;  %v1122_v4 = vadd.f32 %v1871_v62, %v1005_v42  ;;  %v291_v21 = vmul.f32 %v1800_v34, %v2315_v2  ;;  %v444_v62 = vmul.f32 %v1818_v46, %v2326_v63  ;;  %v2346_v38 = vld [vmem:[#allocation38_spill] sm:$0xff] }
 0x4e6   :  { %v914_v43 = vpop.permute.xlu1 %913  ;;  %v910_v3 = vpop.permute.xlu0 %909  ;;  %v322_v13 = vadd.f32 %v290_v32, %v166_v26  ;;  %v292_v46 = vmul.f32 %v1794_v31, %v2315_v2  ;;  %v293_v55 = vmul.f32 %v1804_v36, %v2315_v2  ;;  %v447_v15 = vmul.f32 %v2340_v11, %v2326_v63  ;;  %v2343_v36 = vld [vmem:[#allocation27_spill] sm:$0xff] }
 0x4e7   :  { %v1008_v37 = vadd.f32 %v914_v43, %v473_v17  ;;  %v1007_v59 = vadd.f32 %v910_v3, %v472_v12  ;;  %1226 = vperm.xlu1 %1520, %v1123_v27   ;;  %1223 = vperm.xlu0 %1519, %v1122_v4   ;;  %v476_v16 = vadd.f32 %v444_v62, %v320_v51  ;;  %v2347_v4 = vld [vmem:[#allocation40_spill] sm:$0xff]  ;;  %v2348_v62 = vld [vmem:[#allocation34_spill] sm:$0xff] }
 0x4e8   :  { %v477_v31 = vadd.f32 %v445_v9, %v321_v53  ;;  %v448_v2 = vmul.f32 %v2343_v36, %v2326_v63  ;;  %v325_v20 = vadd.f32 %v293_v55, %v169_v1  ;;  %v324_v30 = vadd.f32 %v292_v46, %v168_v24  ;;  %v2349_v53 = vld [vmem:[#allocation31_spill] sm:$0xff] }
 0x4e9   :  { %v1125_v29 = vadd.f32 %v1873_v45, %v1008_v37  ;;  %v1124_v54 = vadd.f32 %v1875_v52, %v1007_v59  ;;  %v446_v45 = vmul.f32 %v1828_v50, %v2326_v63  ;;  %v323_v52 = vadd.f32 %v291_v21, %v167_v0 }
 0x4ea   :  { %v922_v34 = vpop.permute.xlu1 %921  ;;  %v918_v23 = vpop.permute.xlu0 %917  ;;  %v449_v61 = vmul.f32 %v2344_v48, %v2326_v63  ;;  %v480_v26 = vadd.f32 %v448_v2, %v324_v30 }
 0x4eb   :  { %v1010_v44 = vadd.f32 %v922_v34, %v475_v58  ;;  %v1009_v28 = vadd.f32 %v918_v23, %v474_v14  ;;  %1232 = vperm.xlu1 %1520, %v1125_v29   ;;  %1229 = vperm.xlu0 %1519, %v1124_v54   ;;  %v478_v50 = vadd.f32 %v446_v45, %v322_v13 }
 0x4ec   :  { %v479_v47 = vadd.f32 %v447_v15, %v323_v52  ;;  %v481_v0 = vadd.f32 %v449_v61, %v325_v20  ;;  %v2351_v52 = vld [vmem:[#allocation6_spill] sm:$0xff] }
 0x4ed   :  { %v1127_v10 = vadd.f32 %v2341_v33, %v1010_v44  ;;  %v1126_v6 = vadd.f32 %v2342_v40, %v1009_v28  ;;  %v2350_v44 = vld [vmem:[#allocation5_spill] sm:$0xff] }
 0x4ee   :  { %v930_v22 = vpop.permute.xlu1 %929  ;;  %v926_v35 = vpop.permute.xlu0 %925  ;;  %v1268_v28 = vadd.s32 4294967288, %v2350_v44  ;;  %v1266_v15 = vsub.s32 %v2350_v44, %v2351_v52  ;;  %v1282_v33 = vadd.s32 4294967272, %v2350_v44  ;;  %v1303_v30 = vadd.s32 4294967248, %v2350_v44 }
 0x4ef   :  { %v1012_v39 = vadd.f32 %v930_v22, %v477_v31  ;;  %v1011_v5 = vadd.f32 %v926_v35, %v476_v16  ;;  %1238 = vperm.xlu1 %1520, %v1127_v10   ;;  %1235 = vperm.xlu0 %1519, %v1126_v6   ;;  %v1275_v16 = vadd.s32 4294967280, %v2350_v44  ;;  %v1289_v31 = vadd.s32 4294967264, %v2350_v44 }
 0x4f0   :  { %v1271_v11 = vsub.s32 %v1268_v28, %v2351_v52  ;;  %v1296_v22 = vadd.s32 4294967256, %v2350_v44 }
 0x4f1   :  { %v1129_v56 = vadd.f32 %v2345_v41, %v1012_v39  ;;  %v1128_v42 = vadd.f32 %v2346_v38, %v1011_v5  ;;  %v1278_v6 = vsub.s32 %v1275_v16, %v2351_v52  ;;  %v1285_v5 = vsub.s32 %v1282_v33, %v2351_v52 }
 0x4f2   :  { %v938_v57 = vpop.permute.xlu1 %937  ;;  %v934_v12 = vpop.permute.xlu0 %933  ;;  %v1292_v20 = vsub.s32 %v1289_v31, %v2351_v52  ;;  %v1299_v41 = vsub.s32 %v1296_v22, %v2351_v52  ;;  %v1352_v31 = vadd.s32 4294967192, %v2350_v44 }
 0x4f3   :  { %v1014_v60 = vadd.f32 %v938_v57, %v479_v47  ;;  %v1013_v7 = vadd.f32 %v934_v12, %v478_v50  ;;  %1244 = vperm.xlu1 %1520, %v1129_v56   ;;  %1241 = vperm.xlu0 %1519, %v1128_v42   ;;  %v1310_v56 = vadd.s32 4294967240, %v2350_v44  ;;  %v1317_v47 = vadd.s32 4294967232, %v2350_v44 }
 0x4f5   :  { %v1131_v27 = vadd.f32 %v2320_v8, %v1014_v60  ;;  %v1130_v17 = vadd.f32 %v2347_v4, %v1013_v7 }
 0x4f6   :  { %v946_v32 = vpop.permute.xlu1 %945  ;;  %v942_v43 = vpop.permute.xlu0 %941 }
 0x4f7   :  { %v1016_v63 = vadd.f32 %v946_v32, %v481_v0  ;;  %v1015_v3 = vadd.f32 %v942_v43, %v480_v26  ;;  %1250 = vperm.xlu1 %1520, %v1131_v27   ;;  %1247 = vperm.xlu0 %1519, %v1130_v17   ;;  %v1306_v27 = vsub.s32 %v1303_v30, %v2351_v52  ;;  %v1324_v32 = vadd.s32 4294967224, %v2350_v44 }
 0x4f8   :  { %v1313_v26 = vsub.s32 %v1310_v56, %v2351_v52 }
 0x4f9   :  { %v1133_v37 = vadd.f32 %v2329_v49, %v1016_v63  ;;  %v1132_v59 = vadd.f32 %v2330_v18, %v1015_v3 }
 0x4fa   :  { %v954_v51 = vpop.permute.xlu1 %953  ;;  %v950_v21 = vpop.permute.xlu0 %949 }
 0x4fb   :  { %v1018_v14 = vadd.f32 %v954_v51, %v2348_v62  ;;  %v1017_v8 = vadd.f32 %v950_v21, %v2349_v53  ;;  %1256 = vperm.xlu1 %1520, %v1133_v37   ;;  %1253 = vperm.xlu0 %1519, %v1132_v59   ;;  %v1320_v37 = vsub.s32 %v1317_v47, %v2351_v52 }
 0x4fd   :  { %v1135_v9 = vadd.f32 %v2336_v25, %v1018_v14  ;;  %v1134_v29 = vadd.f32 %v2337_v19, %v1017_v8  ;;  %v1331_v14 = vadd.s32 4294967216, %v2350_v44 }
 0x4ff   :  { %1262 = vperm.xlu1 %1520, %v1135_v9   ;;  %1259 = vperm.xlu0 %1519, %v1134_v29   ;;  %v1327_v29 = vsub.s32 %v1324_v32, %v2351_v52 }
 0x53e   :  { %v1173_v54 = vpop.permute.xlu1 %1172  ;;  %v1170_v58 = vpop.permute.xlu0 %1169 }
 0x53f   :  { %v1272_v35 = vrot.slane %v1173_v54, %v1271_v11  ;;  %v1267_v39 = vrot.slane %v1170_v58, %v1266_v15  ;;  %v1338_v54 = vadd.s32 4294967208, %v2350_v44 }
 0x541   :  { %v1274_v38 = vsel %vm1273_vm10, %v1272_v35, %v1267_v39 }
 0x542   :  { %v1179_v1 = vpop.permute.xlu1 %1178  ;;  %v1176_v49 = vpop.permute.xlu0 %1175 }
 0x543   :  { %v1279_v50 = vrot.slane %v1176_v49, %v1278_v6  ;;  %v1286_v42 = vrot.slane %v1179_v1, %v1285_v5 }
 0x545   :  { %v1281_v60 = vsel %vm1280_vm11, %v1279_v50, %v1274_v38 }
 0x546   :  { %v2121_v24 = vpop.permute.xlu1 %1184  ;;  %v1182_v18 = vpop.permute.xlu0 %1181  ;;  %v1288_v3 = vsel %vm1287_vm12, %v1286_v42, %v1281_v60  ;;  %v1366_v42 = vadd.s32 4294967176, %v2350_v44 }
 0x547   :  { %v1293_v7 = vrot.slane %v1182_v18, %v1292_v20  ;;  %v1300_v63 = vrot.slane %v2121_v24, %v1299_v41  ;;  %v1345_v24 = vadd.s32 4294967200, %v2350_v44 }
 0x549   :  { %v1295_v21 = vsel %vm1294_vm13, %v1293_v7, %v1288_v3 }
 0x54a   :  { %v2123_v34 = vpop.permute.xlu1 %1190  ;;  %v2125_v23 = vpop.permute.xlu0 %1187  ;;  %v1302_v49 = vsel %vm1301_vm14, %v1300_v63, %v1295_v21 }
 0x54b   :  { %v1307_v62 = vrot.slane %v2125_v23, %v1306_v27  ;;  %v1314_v1 = vrot.slane %v2123_v34, %v1313_v26  ;;  %v1341_v34 = vsub.s32 %v1338_v54, %v2351_v52 }
 0x54d   :  { %v1309_v28 = vsel %vm1308_vm15, %v1307_v62, %v1302_v49 }
 0x54e   :  { %v2127_v13 = vpop.permute.xlu1 %1196  ;;  %v2129_v46 = vpop.permute.xlu0 %1193  ;;  %v1316_v39 = vsel %vm1315_vm0, %v1314_v1, %v1309_v28 }
 0x54f   :  { %v1321_v16 = vrot.slane %v2129_v46, %v1320_v37  ;;  %v1328_v35 = vrot.slane %v2127_v13, %v1327_v29  ;;  %v1348_v46 = vsub.s32 %v1345_v24, %v2351_v52  ;;  %v1355_v13 = vsub.s32 %v1352_v31, %v2351_v52 }
 0x552   :  { %v2131_v25 = vpop.permute.xlu1 %1202  ;;  %v2133_v19 = vpop.permute.xlu0 %1199 }
 0x553   :  { %v1342_v56 = vrot.slane %v2131_v25, %v1341_v34 }
 0x556   :  { %v2136_v55 = vpop.permute.xlu1 %1208  ;;  %v2138_v45 = vpop.permute.xlu0 %1205 }
 0x55a   :  { %v2145_v10 = vpop.permute.xlu1 %1214  ;;  %v2147_v40 = vpop.permute.xlu0 %1211 }
 0x55e   :  { %v1221_v36 = vpop.permute.xlu1 %1220  ;;  %v1218_v2 = vpop.permute.xlu0 %1217 }
 0x55f   :  { %v1380_v48 = vrot.slane %v1221_v36, %v1271_v11  ;;  %v1376_v61 = vrot.slane %v1218_v2, %v1266_v15  ;;  %v1334_v11 = vsub.s32 %v1331_v14, %v2351_v52  ;;  %v1323_v2 = vsel %vm1322_vm1, %v1321_v16, %v1316_v39 }
 0x560   :  { %v1330_v38 = vsel %vm1329_vm2, %v1328_v35, %v1323_v2 }
 0x561   :  { %v1381_v17 = vsel %vm1273_vm10, %v1380_v48, %v1376_v61  ;;  %v1335_v50 = vrot.slane %v2133_v19, %v1334_v11 }
 0x562   :  { %v1227_v57 = vpop.permute.xlu1 %1226  ;;  %v1224_v12 = vpop.permute.xlu0 %1223 }
 0x563   :  { %v1385_v4 = vrot.slane %v1224_v12, %v1278_v6  ;;  %v1390_v0 = vrot.slane %v1227_v57, %v1285_v5  ;;  %v1337_v57 = vsel %vm1336_vm3, %v1335_v50, %v1330_v38  ;;  %v1349_v12 = vrot.slane %v2138_v45, %v1348_v46 }
 0x565   :  { %v1386_v43 = vsel %vm1280_vm11, %v1385_v4, %v1381_v17  ;;  %v1356_v17 = vrot.slane %v2136_v55, %v1355_v13 }
 0x566   :  { %v1233_v59 = vpop.permute.xlu1 %1232  ;;  %v1230_v51 = vpop.permute.xlu0 %1229  ;;  %v1391_v9 = vsel %vm1287_vm12, %v1390_v0, %v1386_v43  ;;  %v1344_v0 = vsel %vm1343_vm4, %v1342_v56, %v1337_v57 }
 0x567   :  { %v1395_v53 = vrot.slane %v1230_v51, %v1292_v20  ;;  %v1400_v8 = vrot.slane %v1233_v59, %v1299_v41  ;;  %v1359_v20 = vadd.s32 4294967184, %v2350_v44  ;;  %v1369_v44 = vsub.s32 %v1366_v42, %v2351_v52 }
 0x568   :  { %v1351_v43 = vsel %vm1350_vm5, %v1349_v12, %v1344_v0 }
 0x569   :  { %v1396_v58 = vsel %vm1294_vm13, %v1395_v53, %v1391_v9  ;;  %v1362_v60 = vsub.s32 %v1359_v20, %v2351_v52  ;;  %v1370_v55 = vrot.slane %v2145_v10, %v1369_v44  ;;  %v1358_v51 = vsel %vm1357_vm6, %v1356_v17, %v1351_v43 }
 0x56a   :  { %v1239_v18 = vpop.permute.xlu1 %1238  ;;  %v1236_v23 = vpop.permute.xlu0 %1235  ;;  %v1401_v6 = vsel %vm1301_vm14, %v1400_v8, %v1396_v58 }
 0x56b   :  { %v1405_v15 = vrot.slane %v1236_v23, %v1306_v27  ;;  %v1410_v33 = vrot.slane %v1239_v18, %v1313_v26  ;;  %v1363_v45 = vrot.slane %v2147_v40, %v1362_v60 }
 0x56d   :  { %v1406_v22 = vsel %vm1308_vm15, %v1405_v15, %v1401_v6  ;;  %v1365_v62 = vsel %vm1364_vm7, %v1363_v45, %v1358_v51 }
 0x56e   :  { %v1245_v5 = vpop.permute.xlu1 %1244  ;;  %v1242_v36 = vpop.permute.xlu0 %1241  ;;  %v1411_v61 = vsel %vm1315_vm0, %v1410_v33, %v1406_v22  ;;  %v1372_v9 = vsel %vm1371_vm8, %v1370_v55, %v1365_v62 }
 0x56f   :  { %v1415_v30 = vrot.slane %v1242_v36, %v1320_v37  ;;  %v1420_v48 = vrot.slane %v1245_v5, %v1327_v29 }
 0x571   :  { %v1416_v41 = vsel %vm1322_vm1, %v1415_v30, %v1411_v61 }
 0x572   :  { %v1251_v47 = vpop.permute.xlu1 %1250  ;;  %v1248_v19 = vpop.permute.xlu0 %1247  ;;  %v1421_v4 = vsel %vm1329_vm2, %v1420_v48, %v1416_v41 }
 0x573   :  { %v1425_v7 = vrot.slane %v1248_v19, %v1334_v11  ;;  %v1430_v27 = vrot.slane %v1251_v47, %v1341_v34 }
 0x575   :  { %v1426_v25 = vsel %vm1336_vm3, %v1425_v7, %v1421_v4 }
 0x576   :  { %v1257_v26 = vpop.permute.xlu1 %1256  ;;  %v1254_v32 = vpop.permute.xlu0 %1253  ;;  %v1431_v37 = vsel %vm1343_vm4, %v1430_v27, %v1426_v25 }
 0x577   :  { %v1435_v63 = vrot.slane %v1254_v32, %v1348_v46  ;;  %v1440_v3 = vrot.slane %v1257_v26, %v1355_v13 }
 0x579   :  { %v1436_v59 = vsel %vm1350_vm5, %v1435_v63, %v1431_v37 }
 0x57a   :  { %v1263_v21 = vpop.permute.xlu1 %1262  ;;  %v1260_v52 = vpop.permute.xlu0 %1259  ;;  %v1441_v40 = vsel %vm1357_vm6, %v1440_v3, %v1436_v59 }
 0x57b   :  { %v1450_v14 = vrot.slane %v1263_v21, %v1369_v44  ;;  %v1445_v53 = vrot.slane %v1260_v52, %v1362_v60 }
 0x57d   :  { %v1446_v8 = vsel %vm1364_vm7, %v1445_v53, %v1441_v40 }
 0x57e   :  { %v1451_v29 = vsel %vm1371_vm8, %v1450_v14, %v1446_v8 }
 0x57f   :  { %v1453_v10 = vsel %vm1452_vm9, %v1451_v29, %v1372_v9 }
 0x580   :  { %1455 = vst [vmem:[#allocation2] sm:$0x3] %v1453_v10 }
 0x581   :  { %1570 = shalt.err (!%p1567_p4)
}
 0x582   :  { %1465 = dma.vmem_to_hbm [thread:$0]  %s1463_s20, 32, %s2223_s6, [#allocation3]  }
 0x583   :  { %1579 = dma.done.wait [#allocation3], 32  }
 0x584   :  { %1580 = vsyncadd [#allocation3], 4294967264 }
 0x585   :  { %1469 = vsyncpa [#allocation3], 1 }

</bundles_post_ra>
